<compile_context>
chip_gen: v6e
topology: v6e:2x2x1
jax: 0.10.0
libtpu: 0.0.40
codegen_flags: <defaults>
</compile_context>

<pallas_src>
import functools

import jax
import jax.numpy as jnp
import numpy as np
from jax.experimental import pallas as pl
from jax.experimental.pallas import tpu as pltpu

MASK_VALUE = -3.4028234663852886e+38   # -torch.finfo(float32).max
LN_EPS = 1e-5                          # nn.LayerNorm default eps


def _layernorm(x, gamma, beta):
    mu = jnp.mean(x, axis=-1, keepdims=True)
    var = jnp.mean((x - mu) ** 2, axis=-1, keepdims=True)
    return (x - mu) * jax.lax.rsqrt(var + LN_EPS) * gamma + beta


# ---------------- fused per-layer kernel (grid = (B//Bt, depth)) ----------------
def transformer_layer_kernel(
    # inputs (VMEM; one layer's weight block per depth step)
    mask_ref,                      # (1, N, N)      f32  additive diag mask (grid-invariant)
    x_ref,                         # (Bt, N, D)     f32  initial activation for this batch block
    g1_ref, be1_ref,               # (1, D)         f32  attn LayerNorm
    wqkv_ref,                      # (D, 3*inner)   bf16 fused QKV (exp(temp) folded into Q cols)
    wout_ref,                      # (inner, D)     bf16 output projection
    bout_ref,                      # (1, D)         f32
    g2_ref, be2_ref,               # (1, D)         f32  ff LayerNorm
    w1_ref,                        # (D, M)         bf16
    b1_ref,                        # (1, M)         f32
    w2_ref,                        # (M, D)         bf16
    b2_ref,                        # (1, D)         f32
    # output (VMEM-resident across the depth axis -> doubles as the activation)
    o_ref,                         # (Bt, N, D)     f32
    *, heads, dim_head):
    layer = pl.program_id(1)
    bt, n, d = o_ref.shape
    r = bt * n
    inner = heads * dim_head

    # Load the activation into the resident output block once per batch block.
    @pl.when(layer == 0)
    def _():
        o_ref[...] = x_ref[...]

    x = o_ref[...].reshape(r, d)                     # (R, D) f32

    # ---------------- PreNorm(LSA) + residual ----------------
    xn = _layernorm(x, g1_ref[...], be1_ref[...]).astype(jnp.bfloat16)
    # Single fused lane-dense QKV projection (scale already folded into Wq).
    qkv = jnp.dot(xn, wqkv_ref[...],
                  preferred_element_type=jnp.float32)       # (R, 3*inner) f32
    qkv = qkv.reshape(bt, n, 3 * inner)

    outs = []
    for h in range(heads):                            # short static head loop
        lo = h * dim_head
        q_h = qkv[:, :, lo:lo + dim_head].astype(jnp.bfloat16)              # (Bt,N,dh)
        k_h = qkv[:, :, inner + lo:inner + lo + dim_head].astype(jnp.bfloat16)
        v_h = qkv[:, :, 2 * inner + lo:2 * inner + lo + dim_head].astype(jnp.bfloat16)

        # q @ k^T batched over the batch block; contraction on the last axis.
        dots = jax.lax.dot_general(q_h, k_h, (((2,), (2,)), ((0,), (0,))),
                                   preferred_element_type=jnp.float32)      # (Bt,N,N)
        dots = dots + mask_ref[...]                   # additive diagonal mask

        # softmax in f32; normalization deferred past the attn@V matmul.
        m = jnp.max(dots, axis=-1, keepdims=True)
        p = jnp.exp(dots - m)
        rinv = pl.reciprocal(jnp.sum(p, axis=-1, keepdims=True), approx=True)

        o_h = jax.lax.dot_general(p.astype(jnp.bfloat16), v_h,
                                  (((2,), (1,)), ((0,), (0,))),
                                  preferred_element_type=jnp.float32)       # (Bt,N,dh)
        outs.append(o_h * rinv)

    # Head reduction fused into one MXU matmul: (R, inner) @ (inner, D).
    att = jnp.concatenate(outs, axis=-1).reshape(r, inner)
    y = jnp.dot(att.astype(jnp.bfloat16), wout_ref[...],
                preferred_element_type=jnp.float32) + bout_ref[...]
    x = x + y                                        # residual

    # ---------------- PreNorm(FeedForward) + residual ----------------
    xn2 = _layernorm(x, g2_ref[...], be2_ref[...]).astype(jnp.bfloat16)
    hdd = jnp.dot(xn2, w1_ref[...],
                  preferred_element_type=jnp.float32) + b1_ref[...]
    # exact GELU (nn.GELU default): 0.5*x*(1+erf(x/sqrt(2)))
    hdd = 0.5 * hdd * (1.0 + jax.lax.erf(hdd * jnp.float32(0.7071067811865476)))
    y2 = jnp.dot(hdd.astype(jnp.bfloat16), w2_ref[...],
                 preferred_element_type=jnp.float32) + b2_ref[...]
    x = x + y2                                       # residual

    # Store back; the block only flushes to HBM when the batch block changes.
    o_ref[...] = x.reshape(bt, n, d)
    # TODO(synk): nn.Dropout layers are no-ops at p=0.0 (inference) and are omitted.


# ------------------------------- wrapper helpers -------------------------------
def _choose_batch_block(B, N, target_rows=256):
    """Batch-block size: amortize per-layer weight DMA and fill the MXU M dim."""
    bt = max(1, min(B, max(1, target_rows // max(N, 1))))
    while B % bt:
        bt -= 1
    # v7x has 2 TensorCores; only the (parallel) batch-block axis shards across
    # them, so keep >= 2 blocks when the batch size allows it.
    if B // bt < 2 and bt > 1:
        bt = max(1, bt // 2)
        while B % bt:
            bt -= 1
    return max(bt, 1)


def _vmem_limit_bytes():
    cap = 128 * 1024 * 1024
    try:
        info = pltpu.get_tpu_info()
        cap = int(getattr(info, "vmem_capacity_bytes", cap)) or cap
    except Exception:
        pass
    # Leave headroom for compiler-internal scratch and double-buffered weight
    # DMA: <= 48 MiB on v7x (64 MiB physical per TC), 64 MiB on v5e/v6e.
    return int(min(64 * 1024 * 1024, cap * 3 // 4))


def _stack_params(params, heads, dim_head):
    """Stack per-layer params over depth, lane-dense, bf16 for MXU weights."""
    inner = heads * dim_head
    bf16 = jnp.bfloat16

    def fused_qkv(p):
        # Fold exp(temperature) into the Q columns (one-time, per-layer constant).
        w = p["attn"]["wqkv"]
        scale = jnp.exp(p["attn"]["temp"][0, 0])
        return w.at[:, :inner].multiply(scale)

    return {
        "ln1_g": jnp.stack([p["attn"]["ln_g"] for p in params]),           # (depth,1,D)
        "ln1_b": jnp.stack([p["attn"]["ln_b"] for p in params]),
        "wqkv": jnp.stack([fused_qkv(p) for p in params]).astype(bf16),    # (depth,D,3*inner)
        "wout": jnp.stack([p["attn"]["wout"] for p in params]).astype(bf16),  # (depth,inner,D)
        "bout": jnp.stack([p["attn"]["bout"] for p in params]),
        "ln2_g": jnp.stack([p["ff"]["ln_g"] for p in params]),
        "ln2_b": jnp.stack([p["ff"]["ln_b"] for p in params]),
        "w1": jnp.stack([p["ff"]["w1"] for p in params]).astype(bf16),     # (depth,D,M)
        "b1": jnp.stack([p["ff"]["b1"] for p in params]),
        "w2": jnp.stack([p["ff"]["w2"] for p in params]).astype(bf16),     # (depth,M,D)
        "b2": jnp.stack([p["ff"]["b2"] for p in params]),
    }


def transformer_forward(x, params, heads, dim_head, mlp_dim):
    B, N, D = x.shape
    depth = len(params)
    inner = heads * dim_head
    s = _stack_params(params, heads, dim_head)

    bt = _choose_batch_block(B, N)

    # Additive diagonal mask (0 off-diagonal, MASK_VALUE on the diagonal),
    # built once and kept resident across the whole grid.
    mask = (jnp.eye(N, dtype=jnp.float32) * MASK_VALUE)[None]       # (1, N, N)

    kern = functools.partial(transformer_layer_kernel, heads=heads,
                             dim_head=dim_head)

    def wspec(*shape):   # per-layer weight block, selected by the depth grid axis
        nd = len(shape)
        return pl.BlockSpec((None,) + shape, lambda b, l, _nd=nd: (l,) + (0,) * _nd)

    return pl.pallas_call(
        kern,
        out_shape=jax.ShapeDtypeStruct((B, N, D), x.dtype),
        grid=(B // bt, depth),
        in_specs=[
            pl.BlockSpec((1, N, N), lambda b, l: (0, 0, 0)),        # diag mask
            pl.BlockSpec((bt, N, D), lambda b, l: (b, 0, 0)),       # x (per batch block)
            wspec(1, D), wspec(1, D),                               # attn LN g/b
            wspec(D, 3 * inner),                                    # fused Wqkv
            wspec(inner, D),                                        # Wout
            wspec(1, D),                                            # bout
            wspec(1, D), wspec(1, D),                               # ff LN g/b
            wspec(D, mlp_dim),                                      # W1
            wspec(1, mlp_dim),                                      # b1
            wspec(mlp_dim, D),                                      # W2
            wspec(1, D),                                            # b2
        ],
        # Output block index ignores the depth axis -> resident activation /
        # accumulator across all layers of one batch block.
        out_specs=pl.BlockSpec((bt, N, D), lambda b, l: (b, 0, 0)),
        compiler_params=pltpu.CompilerParams(
            dimension_semantics=("parallel", "arbitrary"),
            vmem_limit_bytes=_vmem_limit_bytes()),
    )(mask, x,
      s["ln1_g"], s["ln1_b"], s["wqkv"], s["wout"], s["bout"],
      s["ln2_g"], s["ln2_b"], s["w1"], s["b1"], s["w2"], s["b2"])


# ----------------------- deterministic parameter init ------------------------
def init_params(key, depth, dim, heads, dim_head, mlp_dim):
    inner = heads * dim_head
    params = []
    for _ in range(depth):
        keys = jax.random.split(key, 5)
        key = keys[0]
        attn = {
            "ln_g": jnp.ones((1, dim), jnp.float32),
            "ln_b": jnp.zeros((1, dim), jnp.float32),
            "wqkv": 0.02 * jax.random.normal(keys[1], (dim, 3 * inner), jnp.float32),
            "temp": jnp.full((1, 1), np.log(dim_head ** -0.5), jnp.float32),
            "wout": 0.02 * jax.random.normal(keys[2], (inner, dim), jnp.float32),
            "bout": jnp.zeros((1, dim), jnp.float32),
        }
        ff = {
            "ln_g": jnp.ones((1, dim), jnp.float32),
            "ln_b": jnp.zeros((1, dim), jnp.float32),
            "w1": 0.02 * jax.random.normal(keys[3], (dim, mlp_dim), jnp.float32),
            "b1": jnp.zeros((1, mlp_dim), jnp.float32),
            "w2": 0.02 * jax.random.normal(keys[4], (mlp_dim, dim), jnp.float32),
            "b2": jnp.zeros((1, dim), jnp.float32),
        }
        params.append({"attn": attn, "ff": ff})
    return params


# ----------------------------- pure-JAX reference (f32) ----------------------
def reference_forward(x, params, heads, dim_head):
    B, N, D = x.shape
    inner = heads * dim_head
    for layer in params:
        pa = layer["attn"]
        xn = _layernorm(x, pa["ln_g"], pa["ln_b"])
        qkv = xn @ pa["wqkv"]
        q, k, v = jnp.split(qkv, 3, axis=-1)
        rs = lambda t: t.reshape(B, N, heads, dim_head).transpose(0, 2, 1, 3)
        q, k, v = rs(q), rs(k), rs(v)
        dots = jnp.einsum("bhnd,bhmd->bhnm", q, k) * jnp.exp(pa["temp"][0, 0])
        eye = jnp.eye(N, dtype=bool)
        dots = jnp.where(eye, MASK_VALUE, dots)
        attn = jax.nn.softmax(dots, axis=-1)
        out = jnp.einsum("bhnm,bhmd->bhnd", attn, v)
        out = out.transpose(0, 2, 1, 3).reshape(B, N, inner)
        x = out @ pa["wout"] + pa["bout"] + x
        pf = layer["ff"]
        xn = _layernorm(x, pf["ln_g"], pf["ln_b"])
        h = xn @ pf["w1"] + pf["b1"]
        h = 0.5 * h * (1.0 + jax.lax.erf(h / jnp.sqrt(2.0)))
        x = h @ pf["w2"] + pf["b2"] + x
    return x


if __name__ == "__main__":
    # Small shapes consistent with the module's forward: x is (B, N, dim).
    # B=4 exercises the batch-blocked path (Bt=2 -> two parallel batch blocks).
    B, N, dim = 4, 8, 32
    depth, heads, dim_head, mlp_dim = 2, 4, 16, 64

    key = jax.random.PRNGKey(0)
    kx, kp = jax.random.split(key)
    x = jax.random.normal(kx, (B, N, dim), jnp.float32)
    params = init_params(kp, depth, dim, heads, dim_head, mlp_dim)

    out = transformer_forward(x, params, heads, dim_head, mlp_dim)
    out = jax.block_until_ready(out)

    ref = reference_forward(x, params, heads, dim_head)
    # bf16 MXU operands (f32 accumulation) vs f32 reference -> relaxed tolerance.
    np.testing.assert_allclose(np.asarray(out), np.asarray(ref),
                               rtol=2e-2, atol=2e-2)
    print("KERNEL_OK")
</pallas_src>

<mosaic_0001>
module attributes {stable_mosaic.version = 11 : i64} {
  func.func @transformer_layer_kernel(%arg0: i32, %arg1: i32, %arg2: memref<1x8x8xf32, #tpu.memory_space<vmem>>, %arg3: memref<2x8x32xf32, #tpu.memory_space<vmem>>, %arg4: memref<1x1x32xf32, #tpu.memory_space<vmem>>, %arg5: memref<1x1x32xf32, #tpu.memory_space<vmem>>, %arg6: memref<1x32x192xbf16, #tpu.memory_space<vmem>>, %arg7: memref<1x64x32xbf16, #tpu.memory_space<vmem>>, %arg8: memref<1x1x32xf32, #tpu.memory_space<vmem>>, %arg9: memref<1x1x32xf32, #tpu.memory_space<vmem>>, %arg10: memref<1x1x32xf32, #tpu.memory_space<vmem>>, %arg11: memref<1x32x64xbf16, #tpu.memory_space<vmem>>, %arg12: memref<1x1x64xf32, #tpu.memory_space<vmem>>, %arg13: memref<1x64x32xbf16, #tpu.memory_space<vmem>>, %arg14: memref<1x1x32xf32, #tpu.memory_space<vmem>>, %arg15: memref<2x8x32xf32, #tpu.memory_space<vmem>>) attributes {dimension_semantics = [#tpu.dimension_semantics<parallel>, #tpu.dimension_semantics<arbitrary>], iteration_bounds = array<i64: 2, 2>, scalar_prefetch = 0 : i64, scratch_operands = 0 : i64, tpu.core_type = #tpu.core_type<tc>, window_params = [{pipeline_mode = #tpu.pipeline_mode<synchronous>, transform_indices = @transform_0, window_bounds = array<i64: 1, 8, 8>}, {transform_indices = @transform_1, window_bounds = array<i64: 2, 8, 32>}, {transform_indices = @transform_2, window_bounds = array<i64: 1, 1, 32>}, {transform_indices = @transform_3, window_bounds = array<i64: 1, 1, 32>}, {transform_indices = @transform_4, window_bounds = array<i64: 1, 32, 192>}, {transform_indices = @transform_5, window_bounds = array<i64: 1, 64, 32>}, {transform_indices = @transform_6, window_bounds = array<i64: 1, 1, 32>}, {transform_indices = @transform_7, window_bounds = array<i64: 1, 1, 32>}, {transform_indices = @transform_8, window_bounds = array<i64: 1, 1, 32>}, {transform_indices = @transform_9, window_bounds = array<i64: 1, 32, 64>}, {transform_indices = @transform_10, window_bounds = array<i64: 1, 1, 64>}, {transform_indices = @transform_11, window_bounds = array<i64: 1, 64, 32>}, {transform_indices = @transform_12, window_bounds = array<i64: 1, 1, 32>}, {transform_indices = @transform_13, window_bounds = array<i64: 2, 8, 32>}]} {
    %c0_i32 = arith.constant 0 : i32
    %0 = arith.cmpi eq, %arg1, %c0_i32 : i32
    %1 = arith.extui %0 : i1 to i32
    %c0_i32_0 = arith.constant 0 : i32
    %2 = arith.cmpi ne, %1, %c0_i32_0 : i32
    scf.if %2 {
      %c0_83 = arith.constant 0 : index
      %c0_84 = arith.constant 0 : index
      %c0_85 = arith.constant 0 : index
      %188 = vector.load %arg3[%c0_83, %c0_84, %c0_85] : memref<2x8x32xf32, #tpu.memory_space<vmem>>, vector<2x8x32xf32>
      %c0_86 = arith.constant 0 : index
      %c0_87 = arith.constant 0 : index
      %c0_88 = arith.constant 0 : index
      %189 = vector.load %arg15[%c0_86, %c0_87, %c0_88] : memref<2x8x32xf32, #tpu.memory_space<vmem>>, vector<2x8x32xf32>
      tpu.vector_store %arg15[%c0_86, %c0_87, %c0_88], %188 {strides = array<i32>} : memref<2x8x32xf32, #tpu.memory_space<vmem>>, vector<2x8x32xf32>,
    } else {
    }
    %c0 = arith.constant 0 : index
    %c0_1 = arith.constant 0 : index
    %c0_2 = arith.constant 0 : index
    %3 = vector.load %arg15[%c0, %c0_1, %c0_2] : memref<2x8x32xf32, #tpu.memory_space<vmem>>, vector<2x8x32xf32>
    %4 = vector.shape_cast %3 : vector<2x8x32xf32> to vector<16x32xf32>
    %c0_3 = arith.constant 0 : index
    %c0_4 = arith.constant 0 : index
    %c0_5 = arith.constant 0 : index
    %5 = vector.load %arg4[%c0_3, %c0_4, %c0_5] : memref<1x1x32xf32, #tpu.memory_space<vmem>>, vector<1x1x32xf32>
    %6 = vector.shape_cast %5 : vector<1x1x32xf32> to vector<1x32xf32>
    %c0_6 = arith.constant 0 : index
    %c0_7 = arith.constant 0 : index
    %c0_8 = arith.constant 0 : index
    %7 = vector.load %arg5[%c0_6, %c0_7, %c0_8] : memref<1x1x32xf32, #tpu.memory_space<vmem>>, vector<1x1x32xf32>
    %8 = vector.shape_cast %7 : vector<1x1x32xf32> to vector<1x32xf32>
    %cst = arith.constant dense<0.000000e+00> : vector<16xf32>
    %9 = vector.multi_reduction <add>, %4, %cst [1] : vector<16x32xf32> to vector<16xf32>
    %10 = vector.shape_cast %9 : vector<16xf32> to vector<16x1xf32>
    %cst_9 = arith.constant 3.200000e+01 : f32
    %11 = vector.broadcast %cst_9 : f32 to vector<16x1xf32>
    %12 = arith.divf %10, %11 : vector<16x1xf32>
    %13 = vector.broadcast %12 : vector<16x1xf32> to vector<16x32xf32>
    %14 = arith.subf %4, %13 : vector<16x32xf32>
    %15 = arith.mulf %14, %14 : vector<16x32xf32>
    %cst_10 = arith.constant dense<0.000000e+00> : vector<16xf32>
    %16 = vector.multi_reduction <add>, %15, %cst_10 [1] : vector<16x32xf32> to vector<16xf32>
    %17 = vector.shape_cast %16 : vector<16xf32> to vector<16x1xf32>
    %cst_11 = arith.constant 3.200000e+01 : f32
    %18 = vector.broadcast %cst_11 : f32 to vector<16x1xf32>
    %19 = arith.divf %17, %18 : vector<16x1xf32>
    %20 = vector.broadcast %12 : vector<16x1xf32> to vector<16x32xf32>
    %21 = arith.subf %4, %20 : vector<16x32xf32>
    %cst_12 = arith.constant 9.99999974E-6 : f32
    %22 = vector.broadcast %cst_12 : f32 to vector<16x1xf32>
    %23 = arith.addf %19, %22 : vector<16x1xf32>
    %24 = math.rsqrt %23 : vector<16x1xf32>
    %25 = vector.broadcast %24 : vector<16x1xf32> to vector<16x32xf32>
    %26 = arith.mulf %21, %25 : vector<16x32xf32>
    %27 = vector.broadcast %6 : vector<1x32xf32> to vector<16x32xf32>
    %28 = arith.mulf %26, %27 : vector<16x32xf32>
    %29 = vector.broadcast %8 : vector<1x32xf32> to vector<16x32xf32>
    %30 = arith.addf %28, %29 : vector<16x32xf32>
    %31 = arith.truncf %30 : vector<16x32xf32> to vector<16x32xbf16>
    %c0_13 = arith.constant 0 : index
    %c0_14 = arith.constant 0 : index
    %c0_15 = arith.constant 0 : index
    %32 = vector.load %arg6[%c0_13, %c0_14, %c0_15] : memref<1x32x192xbf16, #tpu.memory_space<vmem>>, vector<1x32x192xbf16>
    %33 = vector.shape_cast %32 : vector<1x32x192xbf16> to vector<32x192xbf16>
    %cst_16 = arith.constant dense<0.000000e+00> : vector<16x192xf32>
    %34 = tpu.matmul %31, %33, %cst_16 {dimension_numbers = #tpu.dot_dimension_numbers<[1], [0], [0], [1], [0, 0, 1, 1], [], []>} : vector<16x32xbf16>, vector<32x192xbf16>, vector<16x192xf32> -> vector<16x192xf32>
    %35 = vector.shape_cast %34 : vector<16x192xf32> to vector<2x8x192xf32>
    %36 = vector.extract_strided_slice %35 {offsets = [0, 0, 0], sizes = [2, 8, 16], strides = [1, 1, 1]} : vector<2x8x192xf32> to vector<2x8x16xf32>
    %37 = arith.truncf %36 : vector<2x8x16xf32> to vector<2x8x16xbf16>
    %38 = vector.extract_strided_slice %35 {offsets = [0, 0, 64], sizes = [2, 8, 16], strides = [1, 1, 1]} : vector<2x8x192xf32> to vector<2x8x16xf32>
    %39 = arith.truncf %38 : vector<2x8x16xf32> to vector<2x8x16xbf16>
    %40 = vector.extract_strided_slice %35 {offsets = [0, 0, 128], sizes = [2, 8, 16], strides = [1, 1, 1]} : vector<2x8x192xf32> to vector<2x8x16xf32>
    %41 = arith.truncf %40 : vector<2x8x16xf32> to vector<2x8x16xbf16>
    %cst_17 = arith.constant dense<0.000000e+00> : vector<2x8x8xf32>
    %42 = tpu.matmul %37, %39, %cst_17 {dimension_numbers = #tpu.dot_dimension_numbers<[2], [2], [1], [1], [0, 0, 0, 1, 1, 1], [0], [0]>} : vector<2x8x16xbf16>, vector<2x8x16xbf16>, vector<2x8x8xf32> -> vector<2x8x8xf32>
    %c0_18 = arith.constant 0 : index
    %c0_19 = arith.constant 0 : index
    %c0_20 = arith.constant 0 : index
    %43 = vector.load %arg2[%c0_18, %c0_19, %c0_20] : memref<1x8x8xf32, #tpu.memory_space<vmem>>, vector<1x8x8xf32>
    %44 = vector.broadcast %43 : vector<1x8x8xf32> to vector<2x8x8xf32>
    %45 = arith.addf %42, %44 : vector<2x8x8xf32>
    %cst_21 = arith.constant dense<0xFF800000> : vector<2x8xf32>
    %46 = vector.multi_reduction <maximumf>, %45, %cst_21 [2] : vector<2x8x8xf32> to vector<2x8xf32>
    %47 = vector.shape_cast %46 : vector<2x8xf32> to vector<2x8x1xf32>
    %48 = vector.broadcast %47 : vector<2x8x1xf32> to vector<2x8x8xf32>
    %49 = arith.subf %45, %48 : vector<2x8x8xf32>
    %50 = math.exp %49 : vector<2x8x8xf32>
    %cst_22 = arith.constant dense<0.000000e+00> : vector<2x8xf32>
    %51 = vector.multi_reduction <add>, %50, %cst_22 [2] : vector<2x8x8xf32> to vector<2x8xf32>
    %52 = vector.shape_cast %51 : vector<2x8xf32> to vector<2x8x1xf32>
    %53 = tpu.reciprocal %52 {approx = true} : vector<2x8x1xf32> -> vector<2x8x1xf32>
    %54 = arith.truncf %50 : vector<2x8x8xf32> to vector<2x8x8xbf16>
    %cst_23 = arith.constant dense<0.000000e+00> : vector<2x8x16xf32>
    %55 = tpu.matmul %54, %41, %cst_23 {dimension_numbers = #tpu.dot_dimension_numbers<[2], [1], [1], [2], [0, 0, 0, 1, 1, 2], [0], [0]>} : vector<2x8x8xbf16>, vector<2x8x16xbf16>, vector<2x8x16xf32> -> vector<2x8x16xf32>
    %56 = vector.broadcast %53 : vector<2x8x1xf32> to vector<2x8x16xf32>
    %57 = arith.mulf %55, %56 : vector<2x8x16xf32>
    %58 = vector.extract_strided_slice %35 {offsets = [0, 0, 16], sizes = [2, 8, 16], strides = [1, 1, 1]} : vector<2x8x192xf32> to vector<2x8x16xf32>
    %59 = arith.truncf %58 : vector<2x8x16xf32> to vector<2x8x16xbf16>
    %60 = vector.extract_strided_slice %35 {offsets = [0, 0, 80], sizes = [2, 8, 16], strides = [1, 1, 1]} : vector<2x8x192xf32> to vector<2x8x16xf32>
    %61 = arith.truncf %60 : vector<2x8x16xf32> to vector<2x8x16xbf16>
    %62 = vector.extract_strided_slice %35 {offsets = [0, 0, 144], sizes = [2, 8, 16], strides = [1, 1, 1]} : vector<2x8x192xf32> to vector<2x8x16xf32>
    %63 = arith.truncf %62 : vector<2x8x16xf32> to vector<2x8x16xbf16>
    %cst_24 = arith.constant dense<0.000000e+00> : vector<2x8x8xf32>
    %64 = tpu.matmul %59, %61, %cst_24 {dimension_numbers = #tpu.dot_dimension_numbers<[2], [2], [1], [1], [0, 0, 0, 1, 1, 1], [0], [0]>} : vector<2x8x16xbf16>, vector<2x8x16xbf16>, vector<2x8x8xf32> -> vector<2x8x8xf32>
    %c0_25 = arith.constant 0 : index
    %c0_26 = arith.constant 0 : index
    %c0_27 = arith.constant 0 : index
    %65 = vector.load %arg2[%c0_25, %c0_26, %c0_27] : memref<1x8x8xf32, #tpu.memory_space<vmem>>, vector<1x8x8xf32>
    %66 = vector.broadcast %65 : vector<1x8x8xf32> to vector<2x8x8xf32>
    %67 = arith.addf %64, %66 : vector<2x8x8xf32>
    %cst_28 = arith.constant dense<0xFF800000> : vector<2x8xf32>
    %68 = vector.multi_reduction <maximumf>, %67, %cst_28 [2] : vector<2x8x8xf32> to vector<2x8xf32>
    %69 = vector.shape_cast %68 : vector<2x8xf32> to vector<2x8x1xf32>
    %70 = vector.broadcast %69 : vector<2x8x1xf32> to vector<2x8x8xf32>
    %71 = arith.subf %67, %70 : vector<2x8x8xf32>
    %72 = math.exp %71 : vector<2x8x8xf32>
    %cst_29 = arith.constant dense<0.000000e+00> : vector<2x8xf32>
    %73 = vector.multi_reduction <add>, %72, %cst_29 [2] : vector<2x8x8xf32> to vector<2x8xf32>
    %74 = vector.shape_cast %73 : vector<2x8xf32> to vector<2x8x1xf32>
    %75 = tpu.reciprocal %74 {approx = true} : vector<2x8x1xf32> -> vector<2x8x1xf32>
    %76 = arith.truncf %72 : vector<2x8x8xf32> to vector<2x8x8xbf16>
    %cst_30 = arith.constant dense<0.000000e+00> : vector<2x8x16xf32>
    %77 = tpu.matmul %76, %63, %cst_30 {dimension_numbers = #tpu.dot_dimension_numbers<[2], [1], [1], [2], [0, 0, 0, 1, 1, 2], [0], [0]>} : vector<2x8x8xbf16>, vector<2x8x16xbf16>, vector<2x8x16xf32> -> vector<2x8x16xf32>
    %78 = vector.broadcast %75 : vector<2x8x1xf32> to vector<2x8x16xf32>
    %79 = arith.mulf %77, %78 : vector<2x8x16xf32>
    %80 = vector.extract_strided_slice %35 {offsets = [0, 0, 32], sizes = [2, 8, 16], strides = [1, 1, 1]} : vector<2x8x192xf32> to vector<2x8x16xf32>
    %81 = arith.truncf %80 : vector<2x8x16xf32> to vector<2x8x16xbf16>
    %82 = vector.extract_strided_slice %35 {offsets = [0, 0, 96], sizes = [2, 8, 16], strides = [1, 1, 1]} : vector<2x8x192xf32> to vector<2x8x16xf32>
    %83 = arith.truncf %82 : vector<2x8x16xf32> to vector<2x8x16xbf16>
    %84 = vector.extract_strided_slice %35 {offsets = [0, 0, 160], sizes = [2, 8, 16], strides = [1, 1, 1]} : vector<2x8x192xf32> to vector<2x8x16xf32>
    %85 = arith.truncf %84 : vector<2x8x16xf32> to vector<2x8x16xbf16>
    %cst_31 = arith.constant dense<0.000000e+00> : vector<2x8x8xf32>
    %86 = tpu.matmul %81, %83, %cst_31 {dimension_numbers = #tpu.dot_dimension_numbers<[2], [2], [1], [1], [0, 0, 0, 1, 1, 1], [0], [0]>} : vector<2x8x16xbf16>, vector<2x8x16xbf16>, vector<2x8x8xf32> -> vector<2x8x8xf32>
    %c0_32 = arith.constant 0 : index
    %c0_33 = arith.constant 0 : index
    %c0_34 = arith.constant 0 : index
    %87 = vector.load %arg2[%c0_32, %c0_33, %c0_34] : memref<1x8x8xf32, #tpu.memory_space<vmem>>, vector<1x8x8xf32>
    %88 = vector.broadcast %87 : vector<1x8x8xf32> to vector<2x8x8xf32>
    %89 = arith.addf %86, %88 : vector<2x8x8xf32>
    %cst_35 = arith.constant dense<0xFF800000> : vector<2x8xf32>
    %90 = vector.multi_reduction <maximumf>, %89, %cst_35 [2] : vector<2x8x8xf32> to vector<2x8xf32>
    %91 = vector.shape_cast %90 : vector<2x8xf32> to vector<2x8x1xf32>
    %92 = vector.broadcast %91 : vector<2x8x1xf32> to vector<2x8x8xf32>
    %93 = arith.subf %89, %92 : vector<2x8x8xf32>
    %94 = math.exp %93 : vector<2x8x8xf32>
    %cst_36 = arith.constant dense<0.000000e+00> : vector<2x8xf32>
    %95 = vector.multi_reduction <add>, %94, %cst_36 [2] : vector<2x8x8xf32> to vector<2x8xf32>
    %96 = vector.shape_cast %95 : vector<2x8xf32> to vector<2x8x1xf32>
    %97 = tpu.reciprocal %96 {approx = true} : vector<2x8x1xf32> -> vector<2x8x1xf32>
    %98 = arith.truncf %94 : vector<2x8x8xf32> to vector<2x8x8xbf16>
    %cst_37 = arith.constant dense<0.000000e+00> : vector<2x8x16xf32>
    %99 = tpu.matmul %98, %85, %cst_37 {dimension_numbers = #tpu.dot_dimension_numbers<[2], [1], [1], [2], [0, 0, 0, 1, 1, 2], [0], [0]>} : vector<2x8x8xbf16>, vector<2x8x16xbf16>, vector<2x8x16xf32> -> vector<2x8x16xf32>
    %100 = vector.broadcast %97 : vector<2x8x1xf32> to vector<2x8x16xf32>
    %101 = arith.mulf %99, %100 : vector<2x8x16xf32>
    %102 = vector.extract_strided_slice %35 {offsets = [0, 0, 48], sizes = [2, 8, 16], strides = [1, 1, 1]} : vector<2x8x192xf32> to vector<2x8x16xf32>
    %103 = arith.truncf %102 : vector<2x8x16xf32> to vector<2x8x16xbf16>
    %104 = vector.extract_strided_slice %35 {offsets = [0, 0, 112], sizes = [2, 8, 16], strides = [1, 1, 1]} : vector<2x8x192xf32> to vector<2x8x16xf32>
    %105 = arith.truncf %104 : vector<2x8x16xf32> to vector<2x8x16xbf16>
    %106 = vector.extract_strided_slice %35 {offsets = [0, 0, 176], sizes = [2, 8, 16], strides = [1, 1, 1]} : vector<2x8x192xf32> to vector<2x8x16xf32>
    %107 = arith.truncf %106 : vector<2x8x16xf32> to vector<2x8x16xbf16>
    %cst_38 = arith.constant dense<0.000000e+00> : vector<2x8x8xf32>
    %108 = tpu.matmul %103, %105, %cst_38 {dimension_numbers = #tpu.dot_dimension_numbers<[2], [2], [1], [1], [0, 0, 0, 1, 1, 1], [0], [0]>} : vector<2x8x16xbf16>, vector<2x8x16xbf16>, vector<2x8x8xf32> -> vector<2x8x8xf32>
    %c0_39 = arith.constant 0 : index
    %c0_40 = arith.constant 0 : index
    %c0_41 = arith.constant 0 : index
    %109 = vector.load %arg2[%c0_39, %c0_40, %c0_41] : memref<1x8x8xf32, #tpu.memory_space<vmem>>, vector<1x8x8xf32>
    %110 = vector.broadcast %109 : vector<1x8x8xf32> to vector<2x8x8xf32>
    %111 = arith.addf %108, %110 : vector<2x8x8xf32>
    %cst_42 = arith.constant dense<0xFF800000> : vector<2x8xf32>
    %112 = vector.multi_reduction <maximumf>, %111, %cst_42 [2] : vector<2x8x8xf32> to vector<2x8xf32>
    %113 = vector.shape_cast %112 : vector<2x8xf32> to vector<2x8x1xf32>
    %114 = vector.broadcast %113 : vector<2x8x1xf32> to vector<2x8x8xf32>
    %115 = arith.subf %111, %114 : vector<2x8x8xf32>
    %116 = math.exp %115 : vector<2x8x8xf32>
    %cst_43 = arith.constant dense<0.000000e+00> : vector<2x8xf32>
    %117 = vector.multi_reduction <add>, %116, %cst_43 [2] : vector<2x8x8xf32> to vector<2x8xf32>
    %118 = vector.shape_cast %117 : vector<2x8xf32> to vector<2x8x1xf32>
    %119 = tpu.reciprocal %118 {approx = true} : vector<2x8x1xf32> -> vector<2x8x1xf32>
    %120 = arith.truncf %116 : vector<2x8x8xf32> to vector<2x8x8xbf16>
    %cst_44 = arith.constant dense<0.000000e+00> : vector<2x8x16xf32>
    %121 = tpu.matmul %120, %107, %cst_44 {dimension_numbers = #tpu.dot_dimension_numbers<[2], [1], [1], [2], [0, 0, 0, 1, 1, 2], [0], [0]>} : vector<2x8x8xbf16>, vector<2x8x16xbf16>, vector<2x8x16xf32> -> vector<2x8x16xf32>
    %122 = vector.broadcast %119 : vector<2x8x1xf32> to vector<2x8x16xf32>
    %123 = arith.mulf %121, %122 : vector<2x8x16xf32>
    %124 = tpu.concatenate %57, %79, %101, %123 in 2 : vector<2x8x16xf32>, vector<2x8x16xf32>, vector<2x8x16xf32>, vector<2x8x16xf32> -> vector<2x8x64xf32>
    %125 = vector.shape_cast %124 : vector<2x8x64xf32> to vector<16x64xf32>
    %126 = arith.truncf %125 : vector<16x64xf32> to vector<16x64xbf16>
    %c0_45 = arith.constant 0 : index
    %c0_46 = arith.constant 0 : index
    %c0_47 = arith.constant 0 : index
    %127 = vector.load %arg7[%c0_45, %c0_46, %c0_47] : memref<1x64x32xbf16, #tpu.memory_space<vmem>>, vector<1x64x32xbf16>
    %128 = vector.shape_cast %127 : vector<1x64x32xbf16> to vector<64x32xbf16>
    %cst_48 = arith.constant dense<0.000000e+00> : vector<16x32xf32>
    %129 = tpu.matmul %126, %128, %cst_48 {dimension_numbers = #tpu.dot_dimension_numbers<[1], [0], [0], [1], [0, 0, 1, 1], [], []>} : vector<16x64xbf16>, vector<64x32xbf16>, vector<16x32xf32> -> vector<16x32xf32>
    %c0_49 = arith.constant 0 : index
    %c0_50 = arith.constant 0 : index
    %c0_51 = arith.constant 0 : index
    %130 = vector.load %arg8[%c0_49, %c0_50, %c0_51] : memref<1x1x32xf32, #tpu.memory_space<vmem>>, vector<1x1x32xf32>
    %131 = vector.shape_cast %130 : vector<1x1x32xf32> to vector<1x32xf32>
    %132 = vector.broadcast %131 : vector<1x32xf32> to vector<16x32xf32>
    %133 = arith.addf %129, %132 : vector<16x32xf32>
    %134 = arith.addf %4, %133 : vector<16x32xf32>
    %c0_52 = arith.constant 0 : index
    %c0_53 = arith.constant 0 : index
    %c0_54 = arith.constant 0 : index
    %135 = vector.load %arg9[%c0_52, %c0_53, %c0_54] : memref<1x1x32xf32, #tpu.memory_space<vmem>>, vector<1x1x32xf32>
    %136 = vector.shape_cast %135 : vector<1x1x32xf32> to vector<1x32xf32>
    %c0_55 = arith.constant 0 : index
    %c0_56 = arith.constant 0 : index
    %c0_57 = arith.constant 0 : index
    %137 = vector.load %arg10[%c0_55, %c0_56, %c0_57] : memref<1x1x32xf32, #tpu.memory_space<vmem>>, vector<1x1x32xf32>
    %138 = vector.shape_cast %137 : vector<1x1x32xf32> to vector<1x32xf32>
    %cst_58 = arith.constant dense<0.000000e+00> : vector<16xf32>
    %139 = vector.multi_reduction <add>, %134, %cst_58 [1] : vector<16x32xf32> to vector<16xf32>
    %140 = vector.shape_cast %139 : vector<16xf32> to vector<16x1xf32>
    %cst_59 = arith.constant 3.200000e+01 : f32
    %141 = vector.broadcast %cst_59 : f32 to vector<16x1xf32>
    %142 = arith.divf %140, %141 : vector<16x1xf32>
    %143 = vector.broadcast %142 : vector<16x1xf32> to vector<16x32xf32>
    %144 = arith.subf %134, %143 : vector<16x32xf32>
    %145 = arith.mulf %144, %144 : vector<16x32xf32>
    %cst_60 = arith.constant dense<0.000000e+00> : vector<16xf32>
    %146 = vector.multi_reduction <add>, %145, %cst_60 [1] : vector<16x32xf32> to vector<16xf32>
    %147 = vector.shape_cast %146 : vector<16xf32> to vector<16x1xf32>
    %cst_61 = arith.constant 3.200000e+01 : f32
    %148 = vector.broadcast %cst_61 : f32 to vector<16x1xf32>
    %149 = arith.divf %147, %148 : vector<16x1xf32>
    %150 = vector.broadcast %142 : vector<16x1xf32> to vector<16x32xf32>
    %151 = arith.subf %134, %150 : vector<16x32xf32>
    %cst_62 = arith.constant 9.99999974E-6 : f32
    %152 = vector.broadcast %cst_62 : f32 to vector<16x1xf32>
    %153 = arith.addf %149, %152 : vector<16x1xf32>
    %154 = math.rsqrt %153 : vector<16x1xf32>
    %155 = vector.broadcast %154 : vector<16x1xf32> to vector<16x32xf32>
    %156 = arith.mulf %151, %155 : vector<16x32xf32>
    %157 = vector.broadcast %136 : vector<1x32xf32> to vector<16x32xf32>
    %158 = arith.mulf %156, %157 : vector<16x32xf32>
    %159 = vector.broadcast %138 : vector<1x32xf32> to vector<16x32xf32>
    %160 = arith.addf %158, %159 : vector<16x32xf32>
    %161 = arith.truncf %160 : vector<16x32xf32> to vector<16x32xbf16>
    %c0_63 = arith.constant 0 : index
    %c0_64 = arith.constant 0 : index
    %c0_65 = arith.constant 0 : index
    %162 = vector.load %arg11[%c0_63, %c0_64, %c0_65] : memref<1x32x64xbf16, #tpu.memory_space<vmem>>, vector<1x32x64xbf16>
    %163 = vector.shape_cast %162 : vector<1x32x64xbf16> to vector<32x64xbf16>
    %cst_66 = arith.constant dense<0.000000e+00> : vector<16x64xf32>
    %164 = tpu.matmul %161, %163, %cst_66 {dimension_numbers = #tpu.dot_dimension_numbers<[1], [0], [0], [1], [0, 0, 1, 1], [], []>} : vector<16x32xbf16>, vector<32x64xbf16>, vector<16x64xf32> -> vector<16x64xf32>
    %c0_67 = arith.constant 0 : index
    %c0_68 = arith.constant 0 : index
    %c0_69 = arith.constant 0 : index
    %165 = vector.load %arg12[%c0_67, %c0_68, %c0_69] : memref<1x1x64xf32, #tpu.memory_space<vmem>>, vector<1x1x64xf32>
    %166 = vector.shape_cast %165 : vector<1x1x64xf32> to vector<1x64xf32>
    %167 = vector.broadcast %166 : vector<1x64xf32> to vector<16x64xf32>
    %168 = arith.addf %164, %167 : vector<16x64xf32>
    %cst_70 = arith.constant 5.000000e-01 : f32
    %169 = vector.broadcast %cst_70 : f32 to vector<16x64xf32>
    %170 = arith.mulf %169, %168 : vector<16x64xf32>
    %cst_71 = arith.constant 0.707106769 : f32
    %171 = vector.broadcast %cst_71 : f32 to vector<16x64xf32>
    %172 = arith.mulf %168, %171 : vector<16x64xf32>
    %173 = math.erf %172 : vector<16x64xf32>
    %cst_72 = arith.constant 1.000000e+00 : f32
    %174 = vector.broadcast %cst_72 : f32 to vector<16x64xf32>
    %175 = arith.addf %174, %173 : vector<16x64xf32>
    %176 = arith.mulf %170, %175 : vector<16x64xf32>
    %177 = arith.truncf %176 : vector<16x64xf32> to vector<16x64xbf16>
    %c0_73 = arith.constant 0 : index
    %c0_74 = arith.constant 0 : index
    %c0_75 = arith.constant 0 : index
    %178 = vector.load %arg13[%c0_73, %c0_74, %c0_75] : memref<1x64x32xbf16, #tpu.memory_space<vmem>>, vector<1x64x32xbf16>
    %179 = vector.shape_cast %178 : vector<1x64x32xbf16> to vector<64x32xbf16>
    %cst_76 = arith.constant dense<0.000000e+00> : vector<16x32xf32>
    %180 = tpu.matmul %177, %179, %cst_76 {dimension_numbers = #tpu.dot_dimension_numbers<[1], [0], [0], [1], [0, 0, 1, 1], [], []>} : vector<16x64xbf16>, vector<64x32xbf16>, vector<16x32xf32> -> vector<16x32xf32>
    %c0_77 = arith.constant 0 : index
    %c0_78 = arith.constant 0 : index
    %c0_79 = arith.constant 0 : index
    %181 = vector.load %arg14[%c0_77, %c0_78, %c0_79] : memref<1x1x32xf32, #tpu.memory_space<vmem>>, vector<1x1x32xf32>
    %182 = vector.shape_cast %181 : vector<1x1x32xf32> to vector<1x32xf32>
    %183 = vector.broadcast %182 : vector<1x32xf32> to vector<16x32xf32>
    %184 = arith.addf %180, %183 : vector<16x32xf32>
    %185 = arith.addf %134, %184 : vector<16x32xf32>
    %186 = vector.shape_cast %185 : vector<16x32xf32> to vector<2x8x32xf32>
    %c0_80 = arith.constant 0 : index
    %c0_81 = arith.constant 0 : index
    %c0_82 = arith.constant 0 : index
    %187 = vector.load %arg15[%c0_80, %c0_81, %c0_82] : memref<2x8x32xf32, #tpu.memory_space<vmem>>, vector<2x8x32xf32>
    tpu.vector_store %arg15[%c0_80, %c0_81, %c0_82], %186 {strides = array<i32>} : memref<2x8x32xf32, #tpu.memory_space<vmem>>, vector<2x8x32xf32>,
    return
  }
  func.func @transform_0(%arg0: i32, %arg1: i32) -> (i32, i32, i32) {
    %c0_i32 = arith.constant 0 : i32
    %c0_i32_0 = arith.constant 0 : i32
    %c0_i32_1 = arith.constant 0 : i32
    %c0_i32_2 = arith.constant 0 : i32
    return %c0_i32, %c0_i32_0, %c0_i32_1 : i32, i32, i32
  }
  func.func @transform_1(%arg0: i32, %arg1: i32) -> (i32, i32, i32) {
    %c0_i32 = arith.constant 0 : i32
    %c0_i32_0 = arith.constant 0 : i32
    %c0_i32_1 = arith.constant 0 : i32
    return %arg0, %c0_i32, %c0_i32_0 : i32, i32, i32
  }
  func.func @transform_2(%arg0: i32, %arg1: i32) -> (i32, i32, i32) {
    %c0_i32 = arith.constant 0 : i32
    %c0_i32_0 = arith.constant 0 : i32
    %c0_i32_1 = arith.constant 0 : i32
    return %arg1, %c0_i32, %c0_i32_0 : i32, i32, i32
  }
  func.func @transform_3(%arg0: i32, %arg1: i32) -> (i32, i32, i32) {
    %c0_i32 = arith.constant 0 : i32
    %c0_i32_0 = arith.constant 0 : i32
    %c0_i32_1 = arith.constant 0 : i32
    return %arg1, %c0_i32, %c0_i32_0 : i32, i32, i32
  }
  func.func @transform_4(%arg0: i32, %arg1: i32) -> (i32, i32, i32) {
    %c0_i32 = arith.constant 0 : i32
    %c0_i32_0 = arith.constant 0 : i32
    %c0_i32_1 = arith.constant 0 : i32
    return %arg1, %c0_i32, %c0_i32_0 : i32, i32, i32
  }
  func.func @transform_5(%arg0: i32, %arg1: i32) -> (i32, i32, i32) {
    %c0_i32 = arith.constant 0 : i32
    %c0_i32_0 = arith.constant 0 : i32
    %c0_i32_1 = arith.constant 0 : i32
    return %arg1, %c0_i32, %c0_i32_0 : i32, i32, i32
  }
  func.func @transform_6(%arg0: i32, %arg1: i32) -> (i32, i32, i32) {
    %c0_i32 = arith.constant 0 : i32
    %c0_i32_0 = arith.constant 0 : i32
    %c0_i32_1 = arith.constant 0 : i32
    return %arg1, %c0_i32, %c0_i32_0 : i32, i32, i32
  }
  func.func @transform_7(%arg0: i32, %arg1: i32) -> (i32, i32, i32) {
    %c0_i32 = arith.constant 0 : i32
    %c0_i32_0 = arith.constant 0 : i32
    %c0_i32_1 = arith.constant 0 : i32
    return %arg1, %c0_i32, %c0_i32_0 : i32, i32, i32
  }
  func.func @transform_8(%arg0: i32, %arg1: i32) -> (i32, i32, i32) {
    %c0_i32 = arith.constant 0 : i32
    %c0_i32_0 = arith.constant 0 : i32
    %c0_i32_1 = arith.constant 0 : i32
    return %arg1, %c0_i32, %c0_i32_0 : i32, i32, i32
  }
  func.func @transform_9(%arg0: i32, %arg1: i32) -> (i32, i32, i32) {
    %c0_i32 = arith.constant 0 : i32
    %c0_i32_0 = arith.constant 0 : i32
    %c0_i32_1 = arith.constant 0 : i32
    return %arg1, %c0_i32, %c0_i32_0 : i32, i32, i32
  }
  func.func @transform_10(%arg0: i32, %arg1: i32) -> (i32, i32, i32) {
    %c0_i32 = arith.constant 0 : i32
    %c0_i32_0 = arith.constant 0 : i32
    %c0_i32_1 = arith.constant 0 : i32
    return %arg1, %c0_i32, %c0_i32_0 : i32, i32, i32
  }
  func.func @transform_11(%arg0: i32, %arg1: i32) -> (i32, i32, i32) {
    %c0_i32 = arith.constant 0 : i32
    %c0_i32_0 = arith.constant 0 : i32
    %c0_i32_1 = arith.constant 0 : i32
    return %arg1, %c0_i32, %c0_i32_0 : i32, i32, i32
  }
  func.func @transform_12(%arg0: i32, %arg1: i32) -> (i32, i32, i32) {
    %c0_i32 = arith.constant 0 : i32
    %c0_i32_0 = arith.constant 0 : i32
    %c0_i32_1 = arith.constant 0 : i32
    return %arg1, %c0_i32, %c0_i32_0 : i32, i32, i32
  }
  func.func @transform_13(%arg0: i32, %arg1: i32) -> (i32, i32, i32) {
    %c0_i32 = arith.constant 0 : i32
    %c0_i32_0 = arith.constant 0 : i32
    %c0_i32_1 = arith.constant 0 : i32
    return %arg0, %c0_i32, %c0_i32_0 : i32, i32, i32
  }
}

</mosaic_0001>

<bundles_post_ra>
// kernel: tpu_custom_call.1
= control target key start
LH: loop header
LB: loop body
LE: loop exit
PB: predicated region body
PF: predicated region fallthrough
CT: control target
= control target key end

     0   :  { %s3251_s0 = inlined_call_operand.vmem [shape: f32[1,8,8], index: 0, kind: input, shape index: {}]   ;;  %s3252_s1 = inlined_call_operand.vmem [shape: f32[4,8,32], index: 1, kind: input, shape index: {}]   ;;  %s3253_s2 = inlined_call_operand.vmem [shape: f32[2,1,32], index: 2, kind: input, shape index: {}]   ;;  %s3254_s3 = inlined_call_operand.vmem [shape: f32[2,1,32], index: 3, kind: input, shape index: {}]   ;;  %s3255_s4 = inlined_call_operand.vmem [shape: bf16[2,32,192], index: 4, kind: input, shape index: {}]   ;;  %s3256_s5 = inlined_call_operand.vmem [shape: bf16[2,64,32], index: 5, kind: input, shape index: {}]   ;;  %s3257_s6 = inlined_call_operand.vmem [shape: f32[2,1,32], index: 6, kind: input, shape index: {}]   ;;  %s3258_s7 = inlined_call_operand.vmem [shape: f32[2,1,32], index: 7, kind: input, shape index: {}]   ;;  %s3259_s8 = inlined_call_operand.vmem [shape: f32[2,1,32], index: 8, kind: input, shape index: {}]   ;;  %s3260_s9 = inlined_call_operand.vmem [shape: bf16[2,32,64], index: 9, kind: input, shape index: {}]   ;;  %s3261_s10 = inlined_call_operand.vmem [shape: f32[2,1,64], index: 10, kind: input, shape index: {}]   ;;  %s3262_s11 = inlined_call_operand.vmem [shape: bf16[2,64,32], index: 11, kind: input, shape index: {}]   ;;  %s3263_s12 = inlined_call_operand.vmem [shape: f32[2,1,32], index: 12, kind: input, shape index: {}]   ;;  %s3264_s13 = inlined_call_operand.hbm [shape: f32[4,8,32], index: 13, kind: output, shape index: {}]  }
   0x1   :  { %3280 = sst [smem:[#allocation18_spill]] %s3251_s0 }
   0x2   :  { %3281 = sst [smem:[#allocation19_spill]] %s3252_s1 }
   0x3   :  { %3282 = sst [smem:[#allocation20_spill]] %s3255_s4 }
   0x4   :  { %3283 = sst [smem:[#allocation21_spill]] %s3256_s5 }
   0x5   :  { %3284 = sst [smem:[#allocation22_spill]] %s3264_s13 }
   0x6   :  { %18 = vsyncpa [#allocation3], 0 }
   0x7   :  { %20 = vsyncpa [#allocation3 + $0x1], 0  ;;  %s2747_s25 = smov 0   ;;  %s2749_s26 = smov 0  }
   0x8   :  { %s2751_s27 = smov 0   ;;  %s2753_s28 = smov 0  }
   0x9   :  { %s2755_s29 = smov 0   ;;  %s2757_s30 = smov 0  }
   0xa   :  { %s2759_s14 = smov 0   ;;  %s2761_s15 = smov 0  }
   0xb LB: > { %3285 = sst [smem:[#allocation5_spill]] %s2634_s25  ;;  %s2171_s16 = sadd.s32 4294967295, %s2662_s15   ;;  %s2662_s15 = sphi %s2761_s15, %s26_s15   ;;  %s2658_s14 = sphi %s2759_s14, %s3324_s14   ;;  %s2654_s30 = sphi %s2757_s30, %s3323_s30   ;;  %s2650_s29 = sphi %s2755_s29, %s3322_s29   ;;  %s2646_s28 = sphi %s2753_s28, %s3321_s28   ;;  %s2642_s27 = sphi %s2751_s27, %s3320_s27   ;;  %s2638_s26 = sphi %s2749_s26, %s3319_s26   ;;  %s2634_s25 = sphi %s2747_s25, %s3318_s25  }
   0xc   : > { %3286 = sst [smem:[#allocation6_spill]] %s2638_s26  ;;  %s2172_s17 = sadd.s32 4294967294, %s2662_s15  }
   0xd   : > { %3287 = sst [smem:[#allocation7_spill]] %s2642_s27  ;;  %s35_s18 = sadd.s32 1, %s2654_s30 }
   0xe   : > { %3288 = sst [smem:[#allocation8_spill]] %s2646_s28  ;;  %p36_p0 = scmp.ge.s32.totalorder %s35_s18, 2 }
   0xf   : > { %3289 = sst [smem:[#allocation9_spill]] %s2650_s29  ;;  %s38_s19 = sadd.s32 1, %s2658_s14 }
  0x10   : > { %3290 = sst [smem:[#allocation10_spill]] %s2654_s30  ;;  %p388_p1 = scmp.ne.s32.totalorder %s2642_s27, %s2638_s26 }
  0x11   : > { %3291 = sst [smem:[#allocation11_spill]] %s2658_s14  ;;  %p389_p2 = scmp.eq.s32.totalorder %s2171_s16, 3 }
  0x12   : > { %3292 = sst [smem:[#allocation12_spill]] %s2662_s15  ;;  %s3326_s18 = smov (%p36_p0, %s35_s18), 0 }
  0x13   : > { %3293 = sst [smem:[#allocation13_spill]] %s3326_s18  ;;  %s3328_s19 = smov (!%p36_p0, %s38_s19), %s2658_s14 }
  0x14   : > { %p2796_p3 = por %p389_p2, %p388_p1  ;;  %p394_p4 = scmp.ne.s32.totalorder %s2638_s26, %s2634_s25 }
  0x15   : > { %p40_p5 = scmp.ge.s32.totalorder %s3328_s19, 2  ;;  %p395_p6 = scmp.eq.s32.totalorder %s2172_s17, 3 }
  0x16   : > { %s3294_s20 = scalar_select %p2796_p3, 1, 0 }
  0x17   : > { %p2175_p7 = scmp.ge.s32.totalorder %s2662_s15, 1  ;;  %p499_p8 = scmp.lt.s32.totalorder %s2662_s15, 5 }
  0x18   : > { %3295 = sst [smem:[#allocation14_spill]] %s3294_s20  ;;  %s3330_s19 = smov (%p40_p5, %s3328_s19), 0 }
  0x19   : > { %3296 = sst [smem:[#allocation15_spill]] %s3330_s19  ;;  %p2806_p9 = por %p395_p6, %p394_p4 }
  0x1a   : > { %p500_p10 = pnand %p2175_p7, %p499_p8  ;;  %s375_s22 = ssub.s32 %s2658_s14, %s3330_s19 }
  0x1b   : > { %s3297_s21 = scalar_select %p2806_p9, 1, 0 }
  0x1c   : > { %s378_s23 = sadd.s32 1, %s2642_s27  ;;  %p376_p11 = scmp.eq.s32.totalorder %s375_s22, 0 }
  0x1d   : > { %3298 = sst [smem:[#allocation16_spill]] %s3297_s21  ;;  %503 = sbr.rel (%p500_p10) target bundleno = 3404 (0xd4c), region = 72 }
  0x1e   : > { %s2814_s24 = scalar_select %p376_p11, %s2642_s27, %s378_s23  }
  0x1f   : > { %s3268_s16 = sand.u32 (!%p500_p10), 1, %s2638_s26   ;;  %s2177_s17 = sshll.u32 (!%p500_p10), %s2650_s29, 1 }
  0x20   : > { %3299 = sst [smem:[#allocation17_spill]] %s2814_s24  ;;  %s2176_s18 = sshll.u32 (!%p500_p10), %s3268_s16, 4 }
  0x21   : > { %p585_p12 = scmp.lt.s32.totalorder (!%p500_p10), %s2177_s17, 3  ;;  %p590_p13 = scmp.lt.s32.totalorder (!%p500_p10), %s2646_s28, 1 }
  0x22   : > { %s3300_s1 = sld [smem:[#allocation19_spill]]  ;;  %s2877_s21 = scalar_lea.vmem [#allocation2], %s2176_s18 }
  0x23   : > { %s3332_s17 = smov (!%p585_p12, %s2177_s17), 3  ;;  %s3301_s4 = sld [smem:[#allocation20_spill]] }
  0x24   : > { %s2822_s30 = scalar_select %p590_p13, %s2646_s28, 1 }
  0x25   : > { %s2178_s22 = sshll.u32 %s3332_s17, 3  ;;  %s3302_s5 = sld [smem:[#allocation21_spill]] }
  0x26   : > { %s2234_s13 = sshll.u32 %s2822_s30, 5  ;;  %s611_s25 = scalar_lea.vmem %s3258_s7, %s2822_s30 }
  0x27   : > { %s2236_s26 = sshll.u32 %s2822_s30, 4  ;;  %s2871_s24 = scalar_lea.vmem %s3262_s11, %s2234_s13 }
  0x28   : > { %s588_s14 = scalar_lea.vmem %s3300_s1, %s2178_s22  ;;  %s630_s15 = scalar_lea.vmem %s3263_s12, %s2822_s30 }
  0x29   : > { %s2839_s29 = scalar_lea.vmem %s3301_s4, %s2234_s13  ;;  %s2862_s4 = scalar_lea.vmem %s3260_s9, %s2236_s26 }
  0x2a   : > { %s3303_s27 = sld [smem:[#allocation8_spill]] }
  0x2b   : > { %s2844_s28 = scalar_lea.vmem %s3302_s5, %s2234_s13  ;;  %s622_s5 = scalar_lea.vmem %s3261_s10, %s2822_s30 }
  0x30   : > { %p2187_p0 = scmp.ne.s32.totalorder %s3303_s27, 0 }
  0x32   : > { %636 = sbr.rel (%p2187_p0) target bundleno = 57 (0x39), region = 76 }
  0x37   : > { %v637_v0 = vld [vmem:[%s588_s14] sm:$0xff]  ;;  %vm639_vm0 = vcmask 261120   ;;  %v638_v1 = vld [vmem:[%s588_s14 + $0x8] sm:$0xff] }
  0x38   : > { %640 = vst.msk [vmem:[%s2877_s21] sm:$0xff] %vm639_vm0, %v637_v0  ;;  %641 = vst.msk [vmem:[%s2877_s21 + $0x8] sm:$0xff] %vm639_vm0, %v638_v1 }
  0x39 PF: > { %vm646_vm1 = vcmask 261120   ;;  %v2510_v16 = vld [vmem:[%s2839_s29 + $0x14] ss:$8 sps:$4 sm:$0xff]   ;;  %v2512_v17 = vld [vmem:[%s2839_s29 + $0x10] ss:$8 sps:$4 sm:$0xff]   ;;  %v2664_v19 = vmov 0   ;;  %s3304_s27 = scalar_lea.vmem %s3253_s2, %s2822_s30  ;;  %s3305_s18 = scalar_lea.vmem %s3254_s3, %s2822_s30 }
  0x3a   : > { %v2513_v18 = vld [vmem:[%s2839_s29 + $0x4] ss:$8 sps:$4 sm:$0xff]   ;;  %730 = vmatprep.subr.bf16.mxu1 %v2510_v16  ;;  %750 = vmatprep.mubr.bf16.mxu1 %v2664_v19  ;;  %v2515_v20 = vld [vmem:[%s2839_s29] ss:$8 sps:$4 sm:$0xff]   ;;  %v2665_v38 = vmov 0.0   ;;  %vm2666_vm2 = vmmov 0   ;;  %s3307_s29 = scalar_lea.vmem %s3257_s6, %s2822_s30  ;;  %s3308_s20 = scalar_lea.vmem %s3259_s8, %s2822_s30 }
  0x3b   : > { %731 = vmatpush1.bf16.msra.mxu1 %v2512_v17  ;;  %v2188_v29 = vld [vmem:[%s3304_s27] ss:$0 sm:$0xff]  ;;  %2290 = vmatprep.subr.bf16.mxu0 %v2665_v38  ;;  %s2667_s26 = smov 64   ;;  %vm769_vm3 = vcmask 130048   ;;  %vm891_vm4 = vcmask 1043456   ;;  %s3306_s17 = sld [smem:[#allocation18_spill]] }
  0x3c   : > { %732 = vmatprep.subr.bf16.mxu1 %v2513_v18  ;;  %v2189_v33 = vld [vmem:[%s3305_s18] ss:$0 sm:$0xff]  ;;  %2292 = vmatprep.mubr.msk.bf16.mxu0 %vm2666_vm2, %v2665_v38  ;;  %vm865_vm5 = vcmask 64512   ;;  %s2668_s19 = smov 48   ;;  %s2669_s22 = smov 112   ;;  %vm1673_vm6 = vcmask 392192  }
  0x3d   : > { %s2670_s16 = smov 32   ;;  %s2671_s23 = smov 96   ;;  %vm1716_vm7 = vcmask 523264  }
  0x3e   : > { %s2672_s1 = smov 16   ;;  %s2673_s13 = smov 80  }
  0x3f   : > { %v2883_v2 = vld [vmem:[%s2877_s21] sm:$0xff]  ;;  %v2886_v3 = vld [vmem:[%s2877_s21 + $0x8] sm:$0xff]  ;;  %733 = vmatpush1.bf16.msra.mxu1 %v2515_v20  ;;  %s2674_s14 = smov [#allocation2]  }
  0x40   : > { %v647_v4 = vsel %vm646_vm1, %v2883_v2, 0.0  ;;  %v650_v5 = vsel %vm646_vm1, %v2886_v3, 0.0  ;;  %2284 = vmatprep.subr.bf16.mxu1 %v2665_v38  ;;  %s2574_s18 = sshll.u32 %s2674_s14, 4  ;;  %s2575_s18 = int_to_ptr.vmem [resolvable:$false] %s2574_s18 }
  0x41   : > { %648 = vadd.xlane.f32.xlu0 %v647_v4  ;;  %v2948_v53 = vld [vmem:[%s3306_s17] sm:$0xff]  ;;  %s3309_s17 = sld [smem:[#allocation9_spill]] }
  0x45   : > { %651 = vadd.xlane.f32.xlu0 %v650_v5 }
  0xca   : > { %v649_v6 = vpop.xlane.xlu0 %648 }
  0xcb   : > { %v654_v7 = vmul.f32 0.03125, %v649_v6 }
  0xcd   : > { %v656_v8 = vsub.f32 %v2883_v2, %v654_v7 }
  0xce   : > { %v652_v9 = vpop.xlane.xlu0 %651 }
  0xcf   : > { %v655_v10 = vmul.f32 0.03125, %v652_v9  ;;  %v658_v11 = vmul.f32 %v656_v8, %v656_v8 }
  0xd1   : > { %v657_v12 = vsub.f32 %v2886_v3, %v655_v10  ;;  %v660_v13 = vsel %vm646_vm1, %v658_v11, 0.0 }
  0xd2   : > { %661 = vadd.xlane.f32.xlu1 %v660_v13 }
  0xd3   : > { %v659_v14 = vmul.f32 %v657_v12, %v657_v12 }
  0xd5   : > { %v663_v15 = vsel %vm646_vm1, %v659_v14, 0.0 }
  0xd6   : > { %664 = vadd.xlane.f32.xlu1 %v663_v15 }
 0x15b   : > { %v662_v21 = vpop.xlane.xlu1 %661 }
 0x15c   : > { %v666_v22 = vmul.f32 0.03125, %v662_v21 }
 0x15e   : > { %v668_v23 = vadd.f32 1e-05, %v666_v22 }
 0x15f   : > { %v665_v24 = vpop.xlane.xlu1 %664 }
 0x160   : > { %2526 = vrsqrt.f32 %v668_v23  ;;  %v667_v25 = vmul.f32 0.03125, %v665_v24 }
 0x162   : > { %v669_v26 = vadd.f32 1e-05, %v667_v25 }
 0x164   : > { %2528 = vrsqrt.f32 %v669_v26 }
 0x16d   : > { %v2527_v27 = vpop.eup %2526 }
 0x16e   : > { %v672_v28 = vmul.f32 %v2527_v27, %v656_v8 }
 0x170   : > { %v680_v32 = vmul.f32 %v2188_v29, %v672_v28 }
 0x171   : > { %v2529_v30 = vpop.eup %2528 }
 0x172   : > { %v673_v31 = vmul.f32 %v2529_v30, %v657_v12  ;;  %v688_v35 = vadd.f32 %v2189_v33, %v680_v32 }
 0x174   : > { %v681_v34 = vmul.f32 %v2188_v29, %v673_v31 }
 0x176   : > { %v689_v36 = vadd.f32 %v2189_v33, %v681_v34 }
 0x178   : > { %v690_v37 = vpack.c.bf16 %v689_v36, %v688_v35 }
 0x17a   : > { %2194 = vmatmul.mubr.msk.bf16.vlgmr.msra.gmra.mxu1 %vm646_vm1, %v690_v37 }
 0x17b   : > { %2286 = vmatprep.mubr.msk.bf16.mxu1 %vm2666_vm2, %v2665_v38 }
 0x23a   : > { %v752_v39 = vpop.f32.mrf.mxu1 }
 0x23b   : > { %v2917_v40 = vpack.c.bf16 %v752_v39, %v752_v39 }
 0x23c   : > { %v754_v41 = vpop.f32.mrf.mxu1 }
 0x23d   : > { %767 = vrot.lane.b32.xlu0 %v2917_v40, %s2667_s26  ;;  %v2925_v47 = vpack.c.bf16 %v754_v41, %v754_v41 }
 0x23e   : > { %v756_v42 = vpop.f32.mrf.mxu1 }
 0x23f   : > { %v2920_v43 = vpack.c.bf16 %v756_v42, %v756_v42  ;;  %v893_v51 = vsel %vm891_vm4, %v2925_v47, 0 }
 0x240   : > { %v758_v49 = vpop.f32.mrf.mxu1 }
 0x241   : > { %817 = vrot.lane.b32.xlu1 %v2920_v43, %s2667_s26  ;;  %v2929_v50 = vpack.c.bf16 %v758_v49, %v758_v49  ;;  %s2576_s26 = scalar_lea.vmem %s2575_s18, 512 }
 0x243   : > { %v939_v52 = vsel %vm891_vm4, %v2929_v50, 0 }
 0x2af   : > { %v768_v44 = vpop.permute.xlu0 %767 }
 0x2b0   : > { %v774_v45 = vsel %vm769_vm3, %v768_v44, 0 }
 0x2b1   : > { %2285 = vmatpush3.bf16.xpose.msra.mxu1 %v774_v45 }
 0x2b2   : > { %2296 = vmatprep.subr.bf16.mxu1 %v2665_v38 }
 0x2b3   : > { %v818_v46 = vpop.permute.xlu1 %817 }
 0x2b4   : > { %v823_v48 = vsel %vm769_vm3, %v818_v46, 0 }
 0x2b5   : > { %2291 = vmatpush3.bf16.xpose.msra.mxu0 %v823_v48 }
 0x2b6   : > { %2302 = vmatprep.subr.bf16.mxu0 %v2665_v38 }
 0x2b8   : > { %2287 = vmatmul.mubr.msk.bf16.vlgmr.msra.gmra.mxu1 %vm769_vm3, %v2917_v40 }
 0x2b9   : > { %2297 = vmatpush3.bf16.msra.mxu1 %v893_v51  ;;  %2298 = vmatprep.mubr.msk.bf16.mxu1 %vm2666_vm2, %v2665_v38 }
 0x2ba   : > { %2308 = vmatprep.subr.bf16.mxu1 %v2665_v38 }
 0x2bc   : > { %2293 = vmatmul.mubr.msk.bf16.vlgmr.msra.gmra.mxu0 %vm769_vm3, %v2920_v43 }
 0x2bd   : > { %2303 = vmatpush3.bf16.msra.mxu0 %v939_v52  ;;  %2304 = vmatprep.mubr.msk.bf16.mxu0 %vm2666_vm2, %v2665_v38 }
 0x2be   : > { %2314 = vmatprep.subr.bf16.mxu0 %v2665_v38 }
 0x378   : > { %v810_v54 = vpop.f32.mrf.mxu1 }
 0x379   : > { %v811_v55 = vadd.f32 %v810_v54, %v2948_v53 }
 0x37a   : > { %v2288_v56 = vpop.f32.mrf.mxu1 }
 0x37b   : > { %v866_v57 = vsel %vm865_vm5, %v811_v55, -inf }
 0x37c   : > { %v859_v58 = vpop.f32.mrf.mxu0  ;;  %867 = vmax.xlane.f32.xlu1 %v866_v57  ;;  %v813_v59 = vpop.f32.mrf.mxu1 }
 0x37d   : > { %v860_v60 = vadd.f32 %v859_v58, %v2948_v53 }
 0x37e   : > { %v2289_v61 = vpop.f32.mrf.mxu1  ;;  %v2294_v62 = vpop.f32.mrf.mxu0 }
 0x37f   : > { %v869_v63 = vsel %vm865_vm5, %v860_v60, -inf }
 0x380   : > { %870 = vmax.xlane.f32.xlu0 %v869_v63  ;;  %v862_v0 = vpop.f32.mrf.mxu0 }
 0x382   : > { %v2295_v1 = vpop.f32.mrf.mxu0 }
 0x38d   : > { %1035 = vrot.lane.b32.xlu1 %v2920_v43, %s2668_s19 }
 0x391   : > { %983 = vrot.lane.b32.xlu1 %v2917_v40, %s2669_s22 }
 0x395   : > { %1033 = vrot.lane.b32.xlu1 %v2920_v43, %s2669_s22 }
 0x396   : > { %985 = vrot.lane.b32.xlu0 %v2917_v40, %s2668_s19 }
 0x399   : > { %1155 = vrot.lane.b32.xlu1 %v2929_v50, %s2669_s22 }
 0x405   : > { %v868_v4 = vpop.xlane.xlu1 %867 }
 0x406   : > { %v872_v5 = vsub.f32 %v811_v55, %v868_v4 }
 0x408   : > { %v874_v6 = vmul.f32 1.442695, %v872_v5 }
 0x409   : > { %v871_v7 = vpop.xlane.xlu0 %870  ;;  %v1036_v10 = vpop.permute.xlu1 %1035 }
 0x40a   : > { %2530 = vpow2.f32 %v874_v6  ;;  %v873_v8 = vsub.f32 %v860_v60, %v871_v7  ;;  %v1041_v19 = vsel %vm769_vm3, %v1036_v10, 0 }
 0x40c   : > { %v876_v9 = vmul.f32 1.442695, %v873_v8 }
 0x40d   : > { %v986_v12 = vpop.permute.xlu0 %985  ;;  %v984_v13 = vpop.permute.xlu1 %983 }
 0x40e   : > { %2532 = vpow2.f32 %v876_v9  ;;  %v991_v15 = vsel %vm769_vm3, %v986_v12, 0 }
 0x411   : > { %v1034_v18 = vpop.permute.xlu1 %1033 }
 0x415   : > { %v1156_v20 = vpop.permute.xlu1 %1155 }
 0x416   : > { %v1161_v21 = vsel %vm891_vm4, %v1156_v20, 0 }
 0x417   : > { %v2964_v11 = vpop.eup %2530 }
 0x418   : > { %v886_v14 = vpack.c.bf16 %v2964_v11, %v2964_v11 }
 0x41a   : > { %2299 = vmatmul.mubr.msk.bf16.vlgmr.msra.gmra.mxu1 %vm865_vm5, %v886_v14 }
 0x41b   : > { %v2970_v16 = vpop.eup %2532  ;;  %2309 = vmatpush3.bf16.xpose.msra.mxu1 %v991_v15  ;;  %2310 = vmatprep.mubr.msk.bf16.mxu1 %vm2666_vm2, %v2665_v38 }
 0x41c   : > { %v887_v17 = vpack.c.bf16 %v2970_v16, %v2970_v16  ;;  %2320 = vmatprep.subr.bf16.mxu1 %v2665_v38 }
 0x41e   : > { %2305 = vmatmul.mubr.msk.bf16.vlgmr.msra.gmra.mxu0 %vm865_vm5, %v887_v17 }
 0x41f   : > { %2315 = vmatpush3.bf16.xpose.msra.mxu0 %v1041_v19  ;;  %2316 = vmatprep.mubr.msk.bf16.mxu0 %vm2666_vm2, %v2665_v38 }
 0x420   : > { %2326 = vmatprep.subr.bf16.mxu0 %v2665_v38 }
 0x422   : > { %2311 = vmatmul.mubr.msk.bf16.vlgmr.msra.gmra.mxu1 %vm769_vm3, %v984_v13 }
 0x423   : > { %2322 = vmatprep.mubr.msk.bf16.mxu1 %vm2666_vm2, %v2665_v38 }
 0x426   : > { %2317 = vmatmul.mubr.msk.bf16.vlgmr.msra.gmra.mxu0 %vm769_vm3, %v1034_v18 }
 0x427   : > { %2327 = vmatpush3.bf16.msra.mxu0 %v1161_v21  ;;  %2328 = vmatprep.mubr.msk.bf16.mxu0 %vm2666_vm2, %v2665_v38 }
 0x428   : > { %2338 = vmatprep.subr.bf16.mxu0 %v2665_v38 }
 0x4da   : > { %v2990_v22 = vpop.f32.mrf.mxu1 }
 0x4dc   : > { %v2300_v23 = vpop.f32.mrf.mxu1 }
 0x4de   : > { %v932_v24 = vpop.f32.mrf.mxu1  ;;  %v2992_v25 = vpop.f32.mrf.mxu0 }
 0x4e0   : > { %v2301_v26 = vpop.f32.mrf.mxu1  ;;  %v2306_v27 = vpop.f32.mrf.mxu0 }
 0x4e2   : > { %v978_v28 = vpop.f32.mrf.mxu0  ;;  %v1027_v29 = vpop.f32.mrf.mxu1 }
 0x4e3   : > { %v1028_v30 = vadd.f32 %v1027_v29, %v2948_v53 }
 0x4e4   : > { %v2307_v31 = vpop.f32.mrf.mxu0  ;;  %v2312_v32 = vpop.f32.mrf.mxu1 }
 0x4e5   : > { %v1083_v33 = vsel %vm865_vm5, %v1028_v30, -inf }
 0x4e6   : > { %1084 = vmax.xlane.f32.xlu0 %v1083_v33  ;;  %v1030_v34 = vpop.f32.mrf.mxu1  ;;  %v1077_v35 = vpop.f32.mrf.mxu0 }
 0x4e7   : > { %v1078_v36 = vadd.f32 %v1077_v35, %v2948_v53 }
 0x4e8   : > { %v2313_v37 = vpop.f32.mrf.mxu1  ;;  %v2318_v39 = vpop.f32.mrf.mxu0 }
 0x4e9   : > { %v1086_v41 = vsel %vm865_vm5, %v1078_v36, -inf }
 0x4ea   : > { %1087 = vmax.xlane.f32.xlu1 %v1086_v41  ;;  %v1080_v42 = vpop.f32.mrf.mxu0 }
 0x4ec   : > { %v2319_v44 = vpop.f32.mrf.mxu0 }
 0x4fb   : > { %1257 = vrot.lane.b32.xlu1 %v2920_v43, %s2670_s16 }
 0x4fc   : > { %1106 = vrot.lane.b32.xlu0 %v2925_v47, %s2669_s22 }
 0x4ff   : > { %1255 = vrot.lane.b32.xlu1 %v2920_v43, %s2671_s23 }
 0x500   : > { %1207 = vrot.lane.b32.xlu0 %v2917_v40, %s2670_s16 }
 0x503   : > { %1375 = vrot.lane.b32.xlu1 %v2929_v50, %s2671_s23 }
 0x504   : > { %1205 = vrot.lane.b32.xlu0 %v2917_v40, %s2671_s23 }
 0x56f   : > { %v1085_v45 = vpop.xlane.xlu0 %1084 }
 0x570   : > { %v1089_v46 = vsub.f32 %v1028_v30, %v1085_v45 }
 0x572   : > { %v1091_v48 = vmul.f32 1.442695, %v1089_v46 }
 0x573   : > { %v1107_v49 = vpop.permute.xlu0 %1106  ;;  %v1088_v51 = vpop.xlane.xlu1 %1087 }
 0x574   : > { %2534 = vpow2.f32 %v1091_v48  ;;  %v1112_v52 = vsel %vm891_vm4, %v1107_v49, 0  ;;  %v1090_v54 = vsub.f32 %v1078_v36, %v1088_v51 }
 0x575   : > { %2321 = vmatpush3.bf16.msra.mxu1 %v1112_v52 }
 0x576   : > { %v1093_v55 = vmul.f32 1.442695, %v1090_v54  ;;  %2332 = vmatprep.subr.bf16.mxu1 %v2665_v38 }
 0x577   : > { %v1208_v57 = vpop.permute.xlu0 %1207  ;;  %v1258_v58 = vpop.permute.xlu1 %1257 }
 0x578   : > { %2536 = vpow2.f32 %v1093_v55  ;;  %v1213_v60 = vsel %vm769_vm3, %v1208_v57, 0  ;;  %v1263_v0 = vsel %vm769_vm3, %v1258_v58, 0 }
 0x57b   : > { %v1256_v63 = vpop.permute.xlu1 %1255  ;;  %v1206_v1 = vpop.permute.xlu0 %1205 }
 0x57f   : > { %v1376_v4 = vpop.permute.xlu1 %1375 }
 0x580   : > { %v1381_v5 = vsel %vm891_vm4, %v1376_v4, 0 }
 0x581   : > { %v3012_v56 = vpop.eup %2534 }
 0x582   : > { %v1103_v59 = vpack.c.bf16 %v3012_v56, %v3012_v56 }
 0x584   : > { %2323 = vmatmul.mubr.msk.bf16.vlgmr.msra.gmra.mxu1 %vm865_vm5, %v1103_v59 }
 0x585   : > { %v3018_v61 = vpop.eup %2536  ;;  %2333 = vmatpush3.bf16.xpose.msra.mxu1 %v1213_v60  ;;  %2334 = vmatprep.mubr.msk.bf16.mxu1 %vm2666_vm2, %v2665_v38 }
 0x586   : > { %v1104_v62 = vpack.c.bf16 %v3018_v61, %v3018_v61  ;;  %2344 = vmatprep.subr.bf16.mxu1 %v2665_v38 }
 0x588   : > { %2329 = vmatmul.mubr.msk.bf16.vlgmr.msra.gmra.mxu0 %vm865_vm5, %v1104_v62 }
 0x589   : > { %2339 = vmatpush3.bf16.xpose.msra.mxu0 %v1263_v0  ;;  %2340 = vmatprep.mubr.msk.bf16.mxu0 %vm2666_vm2, %v2665_v38 }
 0x58a   : > { %2350 = vmatprep.subr.bf16.mxu0 %v2665_v38 }
 0x58c   : > { %2335 = vmatmul.mubr.msk.bf16.vlgmr.msra.gmra.mxu1 %vm769_vm3, %v1206_v1 }
 0x58d   : > { %2346 = vmatprep.mubr.msk.bf16.mxu1 %vm2666_vm2, %v2665_v38 }
 0x590   : > { %2341 = vmatmul.mubr.msk.bf16.vlgmr.msra.gmra.mxu0 %vm769_vm3, %v1256_v63 }
 0x591   : > { %2351 = vmatpush3.bf16.msra.mxu0 %v1381_v5  ;;  %2352 = vmatprep.mubr.msk.bf16.mxu0 %vm2666_vm2, %v2665_v38 }
 0x592   : > { %2362 = vmatprep.subr.bf16.mxu0 %v2665_v38 }
 0x644   : > { %v3038_v6 = vpop.f32.mrf.mxu1 }
 0x646   : > { %v2324_v7 = vpop.f32.mrf.mxu1 }
 0x648   : > { %v1151_v8 = vpop.f32.mrf.mxu1  ;;  %v3040_v9 = vpop.f32.mrf.mxu0 }
 0x64a   : > { %v2325_v10 = vpop.f32.mrf.mxu1  ;;  %v2330_v12 = vpop.f32.mrf.mxu0 }
 0x64c   : > { %v1200_v13 = vpop.f32.mrf.mxu0  ;;  %v1249_v14 = vpop.f32.mrf.mxu1 }
 0x64d   : > { %v1250_v15 = vadd.f32 %v1249_v14, %v2948_v53 }
 0x64e   : > { %v2331_v17 = vpop.f32.mrf.mxu0  ;;  %v2336_v18 = vpop.f32.mrf.mxu1 }
 0x64f   : > { %v1305_v19 = vsel %vm865_vm5, %v1250_v15, -inf }
 0x650   : > { %1306 = vmax.xlane.f32.xlu0 %v1305_v19  ;;  %v1252_v20 = vpop.f32.mrf.mxu1  ;;  %v1299_v21 = vpop.f32.mrf.mxu0 }
 0x651   : > { %v1300_v23 = vadd.f32 %v1299_v21, %v2948_v53 }
 0x652   : > { %v2337_v24 = vpop.f32.mrf.mxu1  ;;  %v2342_v26 = vpop.f32.mrf.mxu0 }
 0x653   : > { %v1308_v27 = vsel %vm865_vm5, %v1300_v23, -inf }
 0x654   : > { %1309 = vmax.xlane.f32.xlu1 %v1308_v27  ;;  %v1302_v28 = vpop.f32.mrf.mxu0 }
 0x656   : > { %v2343_v29 = vpop.f32.mrf.mxu0 }
 0x665   : > { %1477 = vrot.lane.b32.xlu1 %v2920_v43, %s2672_s1 }
 0x666   : > { %1327 = vrot.lane.b32.xlu0 %v2925_v47, %s2671_s23  ;;  %s1987_s23 = sshll.u32 %s2877_s21, 4  ;;  %s3193_s23 = int_to_ptr.vmem [resolvable:$true] %s1987_s23 }
 0x667   : > { %p2577_p5 = scmp.lt.s32.totalorder %s3193_s23, %s2575_s18 }
 0x669   : > { %1475 = vrot.lane.b32.xlu1 %v2920_v43, %s2673_s13 }
 0x66a   : > { %1427 = vrot.lane.b32.xlu0 %v2917_v40, %s2672_s1 }
 0x66e   : > { %1425 = vrot.lane.b32.xlu0 %v2917_v40, %s2673_s13 }
 0x6d9   : > { %v1307_v30 = vpop.xlane.xlu0 %1306 }
 0x6da   : > { %v1311_v31 = vsub.f32 %v1250_v15, %v1307_v30  ;;  %v1095_v15 = vsel %vm865_vm5, %v3012_v56, 0.0 }
 0x6dc   : > { %v1313_v32 = vmul.f32 1.442695, %v1311_v31  ;;  %v878_v31 = vsel %vm865_vm5, %v2964_v11, 0.0 }
 0x6dd   : > { %v1328_v33 = vpop.permute.xlu0 %1327  ;;  %v1310_v34 = vpop.xlane.xlu1 %1309 }
 0x6de   : > { %2538 = vpow2.f32 %v1313_v32  ;;  %v1333_v35 = vsel %vm891_vm4, %v1328_v33, 0  ;;  %v1312_v36 = vsub.f32 %v1300_v23, %v1310_v34  ;;  %v881_v34 = vsel %vm865_vm5, %v2970_v16, 0.0 }
 0x6df   : > { %2345 = vmatpush3.bf16.msra.mxu1 %v1333_v35 }
 0x6e0   : > { %v1315_v37 = vmul.f32 1.442695, %v1312_v36  ;;  %2356 = vmatprep.subr.bf16.mxu1 %v2665_v38 }
 0x6e1   : > { %v1428_v39 = vpop.permute.xlu0 %1427  ;;  %v1478_v44 = vpop.permute.xlu1 %1477 }
 0x6e2   : > { %2540 = vpow2.f32 %v1315_v37  ;;  %v1433_v42 = vsel %vm769_vm3, %v1428_v39, 0  ;;  %v1483_v46 = vsel %vm769_vm3, %v1478_v44, 0 }
 0x6e5   : > { %v1426_v48 = vpop.permute.xlu0 %1425  ;;  %v1476_v49 = vpop.permute.xlu1 %1475 }
 0x6eb   : > { %v2539_v43 = vpop.eup %2538 }
 0x6ec   : > { %v1325_v41 = vpack.c.bf16 %v2539_v43, %v2539_v43  ;;  %v1317_v17 = vsel %vm865_vm5, %v2539_v43, 0.0 }
 0x6ee   : > { %2347 = vmatmul.mubr.msk.bf16.vlgmr.msra.gmra.mxu1 %vm865_vm5, %v1325_v41 }
 0x6ef   : > { %v2541_v40 = vpop.eup %2540  ;;  %2357 = vmatpush3.bf16.xpose.msra.mxu1 %v1433_v42  ;;  %2358 = vmatprep.mubr.msk.bf16.mxu1 %vm2666_vm2, %v2665_v38 }
 0x6f0   : > { %v1326_v45 = vpack.c.bf16 %v2541_v40, %v2541_v40  ;;  %2368 = vmatprep.subr.bf16.mxu1 %v2665_v38  ;;  %v1320_v18 = vsel %vm865_vm5, %v2541_v40, 0.0 }
 0x6f2   : > { %2353 = vmatmul.mubr.msk.bf16.vlgmr.msra.gmra.mxu0 %vm865_vm5, %v1326_v45 }
 0x6f3   : > { %2363 = vmatpush3.bf16.xpose.msra.mxu0 %v1483_v46  ;;  %2364 = vmatprep.mubr.msk.bf16.mxu0 %vm2666_vm2, %v2665_v38 }
 0x6f4   : > { %2374 = vmatprep.subr.bf16.mxu0 %v2665_v38 }
 0x6f6   : > { %2359 = vmatmul.mubr.msk.bf16.vlgmr.msra.gmra.mxu1 %vm769_vm3, %v1426_v48 }
 0x6f7   : > { %2370 = vmatprep.mubr.msk.bf16.mxu1 %vm2666_vm2, %v2665_v38 }
 0x6fa   : > { %2365 = vmatmul.mubr.msk.bf16.vlgmr.msra.gmra.mxu0 %vm769_vm3, %v1476_v49  ;;  %v2516_v49 = vld [vmem:[%s2844_s28 + $0x18] sm:$0xff]  }
 0x6fb   : > { %2376 = vmatprep.mubr.msk.bf16.mxu0 %vm2666_vm2, %v2665_v38 }
 0x7ae   : > { %v3074_v51 = vpop.f32.mrf.mxu1 }
 0x7b0   : > { %v2348_v52 = vpop.f32.mrf.mxu1 }
 0x7b1   : > { %v2517_v52 = vld [vmem:[%s2844_s28 + $0x10] sm:$0xff]  }
 0x7b2   : > { %v1372_v54 = vpop.f32.mrf.mxu1  ;;  %v3076_v55 = vpop.f32.mrf.mxu0 }
 0x7b3   : > { %v2519_v54 = vld [vmem:[%s2844_s28] sm:$0xff]  }
 0x7b4   : > { %v2349_v57 = vpop.f32.mrf.mxu1  ;;  %v2354_v58 = vpop.f32.mrf.mxu0 }
 0x7b6   : > { %v1420_v59 = vpop.f32.mrf.mxu0  ;;  %v1469_v60 = vpop.f32.mrf.mxu1 }
 0x7b7   : > { %v1470_v62 = vadd.f32 %v1469_v60, %v2948_v53 }
 0x7b8   : > { %v2355_v63 = vpop.f32.mrf.mxu0  ;;  %v2360_v0 = vpop.f32.mrf.mxu1 }
 0x7b9   : > { %v1525_v1 = vsel %vm865_vm5, %v1470_v62, -inf }
 0x7ba   : > { %1526 = vmax.xlane.f32.xlu0 %v1525_v1  ;;  %v1472_v4 = vpop.f32.mrf.mxu1  ;;  %v1519_v5 = vpop.f32.mrf.mxu0 }
 0x7bb   : > { %v1520_v7 = vadd.f32 %v1519_v5, %v2948_v53  ;;  %v1098_v53 = vsel %vm865_vm5, %v3018_v61, 0.0 }
 0x7bc   : > { %v2361_v8 = vpop.f32.mrf.mxu1  ;;  %v2366_v10 = vpop.f32.mrf.mxu0 }
 0x7bd   : > { %v1528_v12 = vsel %vm865_vm5, %v1520_v7, -inf }
 0x7be   : > { %1529 = vmax.xlane.f32.xlu1 %v1528_v12  ;;  %v1522_v13 = vpop.f32.mrf.mxu0 }
 0x7c0   : > { %v2367_v14 = vpop.f32.mrf.mxu0 }
 0x7cf   : > { %1595 = vrot.lane.b32.xlu1 %v2929_v50, %s2673_s13 }
 0x7d0   : > { %1547 = vrot.lane.b32.xlu0 %v2925_v47, %s2673_s13 }
 0x7ef   : > { %1096 = vadd.xlane.f32.xlu0 %v1095_v15 }
 0x7f3   : > { %1318 = vadd.xlane.f32.xlu0 %v1317_v17  ;;  %1099 = vadd.xlane.f32.xlu1 %v1098_v53 }
 0x7f7   : > { %1321 = vadd.xlane.f32.xlu0 %v1320_v18 }
 0x843   : > { %v1527_v19 = vpop.xlane.xlu0 %1526 }
 0x844   : > { %v1531_v20 = vsub.f32 %v1470_v62, %v1527_v19 }
 0x846   : > { %v1533_v50 = vmul.f32 1.442695, %v1531_v20 }
 0x847   : > { %v1548_v21 = vpop.permute.xlu0 %1547  ;;  %v1530_v23 = vpop.xlane.xlu1 %1529 }
 0x848   : > { %2542 = vpow2.f32 %v1533_v50  ;;  %v1553_v47 = vsel %vm891_vm4, %v1548_v21, 0  ;;  %v1532_v56 = vsub.f32 %v1520_v7, %v1530_v23 }
 0x849   : > { %2369 = vmatpush3.bf16.msra.mxu1 %v1553_v47 }
 0x84a   : > { %v1535_v24 = vmul.f32 1.442695, %v1532_v56  ;;  %2380 = vmatprep.subr.bf16.mxu1 %v2665_v38 }
 0x84b   : > { %v1596_v26 = vpop.permute.xlu1 %1595 }
 0x84c   : > { %2544 = vpow2.f32 %v1535_v24  ;;  %v1601_v61 = vsel %vm891_vm4, %v1596_v26, 0 }
 0x84d   : > { %2375 = vmatpush3.bf16.msra.mxu0 %v1601_v61 }
 0x84e   : > { %2392 = vmatprep.subr.bf16.mxu0 %v2665_v38 }
 0x855   : > { %v2543_v27 = vpop.eup %2542 }
 0x856   : > { %v1537_v28 = vsel %vm865_vm5, %v2543_v27, 0.0  ;;  %v1545_v29 = vpack.c.bf16 %v2543_v27, %v2543_v27 }
 0x857   : > { %1538 = vadd.xlane.f32.xlu0 %v1537_v28 }
 0x858   : > { %2371 = vmatmul.mubr.msk.bf16.vlgmr.msra.gmra.mxu1 %vm865_vm5, %v1545_v29 }
 0x859   : > { %v2545_v30 = vpop.eup %2544  ;;  %2388 = vmatprep.mubr.msk.bf16.mxu1 %vm2666_vm2, %v2665_v38  ;;  %2381 = vmatpush3.bf16.msra.mxu1 %v2516_v49  ;;  %v2521_v49 = vld [vmem:[%s2862_s4] sm:$0xff]  }
 0x85a   : > { %v1540_v32 = vsel %vm865_vm5, %v2545_v30, 0.0  ;;  %v1546_v33 = vpack.c.bf16 %v2545_v30, %v2545_v30  ;;  %2382 = vmatprep.subr.bf16.mxu1 %v2665_v38 }
 0x85b   : > { %879 = vadd.xlane.f32.xlu0 %v878_v31  ;;  %1541 = vadd.xlane.f32.xlu1 %v1540_v32 }
 0x85c   : > { %2377 = vmatmul.mubr.msk.bf16.vlgmr.msra.gmra.mxu0 %vm865_vm5, %v1546_v33 }
 0x85d   : > { %2396 = vmatprep.mubr.msk.bf16.mxu0 %vm2666_vm2, %v2665_v38  ;;  %2383 = vmatpush3.bf16.msra.mxu1 %v2517_v52 }
 0x85e   : > { %2384 = vmatprep.subr.bf16.mxu1 %v2665_v38 }
 0x85f   : > { %882 = vadd.xlane.f32.xlu1 %v881_v34 }
 0x878   : > { %v1097_v35 = vpop.xlane.xlu0 %1096 }
 0x879   : > { %2546 = vrcp.f32 %v1097_v35 }
 0x87c   : > { %v1319_v36 = vpop.xlane.xlu0 %1318  ;;  %v1100_v37 = vpop.xlane.xlu1 %1099 }
 0x87d   : > { %2548 = vrcp.f32 %v1100_v37 }
 0x87e   : > { %2550 = vrcp.f32 %v1319_v36 }
 0x880   : > { %v1322_v11 = vpop.xlane.xlu0 %1321 }
 0x881   : > { %2552 = vrcp.f32 %v1322_v11 }
 0x886   : > { %v2547_v43 = vpop.eup %2546 }
 0x887   : > { %v1203_v42 = vmul.f32 %v2547_v43, %v3038_v6  ;;  %v2518_v6 = vld [vmem:[%s2844_s28 + $0x8] sm:$0xff]   ;;  %s3312_s28 = sld [smem:[#allocation22_spill]] }
 0x888   : > { %2385 = vmatpush3.bf16.msra.mxu1 %v2518_v6 }
 0x889   : > { %2386 = vmatprep.subr.bf16.mxu1 %v2665_v38 }
 0x88a   : > { %v2549_v39 = vpop.eup %2548 }
 0x88b   : > { %v2551_v41 = vpop.eup %2550  ;;  %v1204_v40 = vmul.f32 %v2549_v39, %v3040_v9 }
 0x88c   : > { %v1423_v45 = vmul.f32 %v2551_v41, %v3074_v51  ;;  %2387 = vmatpush3.bf16.msra.mxu1 %v2519_v54 }
 0x88d   : > { %v2495_v44 = vpack.i.bf16 %v1204_v40, %v1203_v42 }
 0x88e   : > { %v2553_v16 = vpop.eup %2552 }
 0x88f   : > { %v1424_v46 = vmul.f32 %v2553_v16, %v3076_v55  ;;  %2496 = vrot.lane.b32.xlu0 %v2495_v44, %s2672_s1 }
 0x891   : > { %v2500_v48 = vpack.i.bf16 %v1424_v46, %v1423_v45 }
 0x893   : > { %2501 = vrot.lane.b32.xlu1 %v2500_v48, %s2670_s16  ;;  %v2520_v48 = vld [vmem:[%s2862_s4 + $0x8] sm:$0xff]   ;;  %s2238_s16 = sshll.u32 %s3309_s17, 8  ;;  %s3313_s4 = smov %s3312_s28 }
 0x894   : > { %2393 = vmatpush3.bf16.msra.mxu0 %v2520_v48  ;;  %s3191_s27 = scalar_lea.hbm %s3312_s28, %s2238_s16 }
 0x895   : > { %2394 = vmatprep.subr.bf16.mxu0 %v2665_v38 }
 0x898   : > { %2395 = vmatpush3.bf16.msra.mxu0 %v2521_v49 }
 0x899   : > { %2400 = vmatprep.subr.bf16.mxu0 %v2665_v38 }
 0x8e0   : > { %v1539_v9 = vpop.xlane.xlu0 %1538 }
 0x8e1   : > { %2554 = vrcp.f32 %v1539_v9 }
 0x8e4   : > { %v1542_v51 = vpop.xlane.xlu1 %1541  ;;  %v880_v10 = vpop.xlane.xlu0 %879 }
 0x8e5   : > { %2556 = vrcp.f32 %v1542_v51 }
 0x8e6   : > { %2558 = vrcp.f32 %v880_v10  ;;  %v2523_v10 = vld [vmem:[%s2871_s24 + $0x10] sm:$0xff]  }
 0x8e8   : > { %v883_v12 = vpop.xlane.xlu1 %882 }
 0x8e9   : > { %2560 = vrcp.f32 %v883_v12  ;;  %v2524_v12 = vld [vmem:[%s2871_s24 + $0x8] sm:$0xff]  }
 0x8ee   : > { %v2555_v58 = vpop.eup %2554 }
 0x8f2   : > { %v2557_v59 = vpop.eup %2556 }
 0x8f3   : > { %v2559_v14 = vpop.eup %2558 }
 0x8f4   : > { %v981_v50 = vmul.f32 %v2559_v14, %v2990_v22  ;;  %v2211_v22 = vld [vmem:[%s3307_s29] ss:$0 sm:$0xff]  ;;  %s2570_s29 = scalar_lea.vmem %s3193_s23, 256 }
 0x8f5   : > { %v2219_v14 = vld [vmem:[%s622_s5] ss:$0 sm:$0xff]  ;;  %p2571_p1 = scmp.ne.s32.totalorder %s3193_s23, %s2570_s29  ;;  %p2578_p6 = scmp.lt.s32.totalorder %s2576_s26, %s2570_s29 }
 0x8f6   : > { %v2561_v17 = vpop.eup %2560 }
 0x8f7   : > { %v982_v21 = vmul.f32 %v2561_v17, %v2992_v25  ;;  %p2572_p2 = pnand %p2571_p1, %p2796_p3  ;;  %p2579_p7 = por %p2578_p6, %p2577_p5 }
 0x8f9   : > { %p2573_p4 = pneg %p2572_p2 }
 0x8fb   : > { %p2580_p8 = pnand %p2579_p7, %p2573_p4 }
 0x901   : > { %v2497_v13 = vpop.permute.xlu0 %2496 }
 0x902   : > { %v2499_v53 = vunpack.i.h.bf16 %v2497_v13  ;;  %v2498_v18 = vunpack.i.l.bf16 %v2497_v13  ;;  %v2525_v13 = vld [vmem:[%s2871_s24] sm:$0xff]  }
 0x904   : > { %v1669_v47 = vsel %vm769_vm3, %v981_v50, %v2498_v18  ;;  %v1670_v56 = vsel %vm769_vm3, %v982_v21, %v2499_v53 }
 0x905   : > { %v2502_v15 = vpop.permute.xlu1 %2501 }
 0x906   : > { %v2504_v19 = vunpack.i.h.bf16 %v2502_v15  ;;  %v2503_v20 = vunpack.i.l.bf16 %v2502_v15 }
 0x908   : > { %v1672_v61 = vsel %vm646_vm1, %v1670_v56, %v2504_v19  ;;  %v1671_v27 = vsel %vm646_vm1, %v1669_v47, %v2503_v20 }
 0x918   : > { %v1589_v55 = vpop.f32.mrf.mxu1 }
 0x919   : > { %v1643_v63 = vmul.f32 %v2555_v58, %v1589_v55 }
 0x91a   : > { %v2372_v57 = vpop.f32.mrf.mxu1 }
 0x91c   : > { %v1592_v60 = vpop.f32.mrf.mxu1  ;;  %v1637_v62 = vpop.f32.mrf.mxu0 }
 0x91d   : > { %v1644_v0 = vmul.f32 %v2557_v59, %v1637_v62  ;;  %v2217_v59 = vld [vmem:[%s611_s25] ss:$0 sm:$0xff] }
 0x91e   : > { %v2373_v1 = vpop.f32.mrf.mxu1  ;;  %v2378_v4 = vpop.f32.mrf.mxu0 }
 0x91f   : > { %v2505_v5 = vpack.i.bf16 %v1644_v0, %v1643_v63  ;;  %v2218_v0 = vld [vmem:[%s3308_s20] ss:$0 sm:$0xff] }
 0x920   : > { %v1640_v7 = vpop.f32.mrf.mxu0 }
 0x921   : > { %2506 = vrot.lane.b32.xlu1 %v2505_v5, %s2668_s19  ;;  %s3310_s19 = sld [smem:[#allocation6_spill]] }
 0x922   : > { %v2379_v8 = vpop.f32.mrf.mxu0 }
 0x923   : > { %v2522_v8 = vld [vmem:[%s2871_s24 + $0x18] sm:$0xff]  }
 0x927   : > { %s3314_s30 = sand.u32 1, %s3310_s19  }
 0x993   : > { %v2507_v23 = vpop.permute.xlu1 %2506 }
 0x994   : > { %v2509_v24 = vunpack.i.h.bf16 %v2507_v23  ;;  %v2508_v26 = vunpack.i.l.bf16 %v2507_v23 }
 0x996   : > { %v1675_v28 = vsel %vm1673_vm6, %v1672_v61, %v2509_v24  ;;  %v1674_v29 = vsel %vm1673_vm6, %v1671_v27, %v2508_v26 }
 0x997   : > { %v1676_v30 = vpack.c.bf16 %v1675_v28, %v1674_v29  ;;  %v2223_v29 = vld [vmem:[%s630_s15] ss:$0 sm:$0xff]  ;;  %s3200_s15 = scalar_lea.sflag [#allocation3], %s3314_s30 }
 0x999   : > { %2389 = vmatmul.mubr.msk.bf16.vlgmr.msra.gmra.mxu1 %vm1716_vm7, %v1676_v30 }
 0xa59   : > { %v1754_v25 = vpop.f32.mrf.mxu1 }
 0xa5a   : > { %v1755_v31 = vadd.f32 %v2211_v22, %v1754_v25 }
 0xa5b   : > { %v2390_v32 = vpop.f32.mrf.mxu1 }
 0xa5c   : > { %v3135_v33 = vadd.f32 %v1755_v31, %v2883_v2 }
 0xa5d   : > { %v1757_v34 = vpop.f32.mrf.mxu1 }
 0xa5e   : > { %v1758_v35 = vadd.f32 %v2211_v22, %v1757_v34  ;;  %v1765_v36 = vsel %vm646_vm1, %v3135_v33, 0.0 }
 0xa5f   : > { %1766 = vadd.xlane.f32.xlu1 %v1765_v36  ;;  %v2391_v37 = vpop.f32.mrf.mxu1 }
 0xa60   : > { %v3140_v11 = vadd.f32 %v1758_v35, %v2886_v3 }
 0xa62   : > { %v1768_v43 = vsel %vm646_vm1, %v3140_v11, 0.0 }
 0xa63   : > { %1769 = vadd.xlane.f32.xlu0 %v1768_v43 }
 0xae8   : > { %v1767_v39 = vpop.xlane.xlu1 %1766 }
 0xae9   : > { %v1771_v41 = vmul.f32 0.03125, %v1767_v39 }
 0xaeb   : > { %v1773_v2 = vsub.f32 %v3135_v33, %v1771_v41 }
 0xaec   : > { %v1770_v42 = vpop.xlane.xlu0 %1769 }
 0xaed   : > { %v1772_v40 = vmul.f32 0.03125, %v1770_v42  ;;  %v1775_v16 = vmul.f32 %v1773_v2, %v1773_v2 }
 0xaef   : > { %v1774_v44 = vsub.f32 %v3140_v11, %v1772_v40  ;;  %v1777_v45 = vsel %vm646_vm1, %v1775_v16, 0.0 }
 0xaf0   : > { %1778 = vadd.xlane.f32.xlu0 %v1777_v45 }
 0xaf1   : > { %v1776_v46 = vmul.f32 %v1774_v44, %v1774_v44 }
 0xaf3   : > { %v1780_v3 = vsel %vm646_vm1, %v1776_v46, 0.0 }
 0xaf4   : > { %1781 = vadd.xlane.f32.xlu0 %v1780_v3 }
 0xb79   : > { %v1779_v52 = vpop.xlane.xlu0 %1778 }
 0xb7a   : > { %v1783_v6 = vmul.f32 0.03125, %v1779_v52 }
 0xb7c   : > { %v1785_v9 = vadd.f32 1e-05, %v1783_v6 }
 0xb7d   : > { %v1782_v51 = vpop.xlane.xlu0 %1781 }
 0xb7e   : > { %2562 = vrsqrt.f32 %v1785_v9  ;;  %v1784_v54 = vmul.f32 0.03125, %v1782_v51 }
 0xb80   : > { %v1786_v55 = vadd.f32 1e-05, %v1784_v54 }
 0xb82   : > { %2564 = vrsqrt.f32 %v1786_v55 }
 0xb8b   : > { %v2563_v57 = vpop.eup %2562 }
 0xb8c   : > { %v1789_v58 = vmul.f32 %v2563_v57, %v1773_v2 }
 0xb8e   : > { %v1797_v63 = vmul.f32 %v2217_v59, %v1789_v58 }
 0xb8f   : > { %v2565_v60 = vpop.eup %2564 }
 0xb90   : > { %v1790_v62 = vmul.f32 %v2565_v60, %v1774_v44  ;;  %v1805_v4 = vadd.f32 %v2218_v0, %v1797_v63 }
 0xb92   : > { %v1798_v1 = vmul.f32 %v2217_v59, %v1790_v62 }
 0xb94   : > { %v1806_v5 = vadd.f32 %v2218_v0, %v1798_v1 }
 0xb96   : > { %v1807_v7 = vpack.c.bf16 %v1806_v5, %v1805_v4 }
 0xb98   : > { %2397 = vmatmul.mubr.msk.bf16.vlgmr.msra.gmra.mxu0 %vm646_vm1, %v1807_v7 }
 0xb99   : > { %2408 = vmatprep.mubr.msk.bf16.mxu0 %vm2666_vm2, %v2665_v38  ;;  %2401 = vmatpush3.bf16.msra.mxu0 %v2522_v8 }
 0xb9a   : > { %2402 = vmatprep.subr.bf16.mxu0 %v2665_v38 }
 0xb9d   : > { %2403 = vmatpush3.bf16.msra.mxu0 %v2523_v10 }
 0xb9e   : > { %2404 = vmatprep.subr.bf16.mxu0 %v2665_v38 }
 0xba1   : > { %2405 = vmatpush3.bf16.msra.mxu0 %v2524_v12 }
 0xba2   : > { %2406 = vmatprep.subr.bf16.mxu0 %v2665_v38 }
 0xba5   : > { %2407 = vmatpush3.bf16.msra.mxu0 %v2525_v13 }
 0xc58   : > { %v1868_v15 = vpop.f32.mrf.mxu0 }
 0xc59   : > { %v1869_v17 = vadd.f32 %v2219_v14, %v1868_v15 }
 0xc5a   : > { %v2398_v53 = vpop.f32.mrf.mxu0 }
 0xc5b   : > { %v1877_v18 = vmul.f32 0.70710677, %v1869_v17  ;;  %v1875_v56 = vmul.f32 0.5, %v1869_v17 }
 0xc5c   : > { %v1871_v19 = vpop.f32.mrf.mxu0 }
 0xc5d   : > { %2566 = verf.f32 %v1877_v18  ;;  %v1872_v20 = vadd.f32 %v2219_v14, %v1871_v19 }
 0xc5e   : > { %v2399_v50 = vpop.f32.mrf.mxu0 }
 0xc5f   : > { %v1878_v21 = vmul.f32 0.70710677, %v1872_v20  ;;  %v1876_v24 = vmul.f32 0.5, %v1872_v20 }
 0xc61   : > { %2568 = verf.f32 %v1878_v21 }
 0xc6a   : > { %v2567_v38 = vpop.eup %2566 }
 0xc6b   : > { %v1881_v23 = vadd.f32 1.0, %v2567_v38 }
 0xc6d   : > { %v1883_v61 = vmul.f32 %v1881_v23, %v1875_v56 }
 0xc6e   : > { %v2569_v47 = vpop.eup %2568 }
 0xc6f   : > { %v1882_v26 = vadd.f32 1.0, %v2569_v47 }
 0xc71   : > { %v1884_v27 = vmul.f32 %v1882_v26, %v1876_v24 }
 0xc73   : > { %v1885_v28 = vpack.c.bf16 %v1884_v27, %v1883_v61 }
 0xc75   : > { %2409 = vmatmul.mubr.msk.bf16.vlgmr.msra.gmra.mxu0 %vm1716_vm7, %v1885_v28 }
 0xd35   : > { %v1962_v30 = vpop.f32.mrf.mxu0 }
 0xd36   : > { %v1963_v22 = vadd.f32 %v2223_v29, %v1962_v30 }
 0xd37   : > { %v2410_v25 = vpop.f32.mrf.mxu0 }
 0xd38   : > { %v1969_v31 = vadd.f32 %v1963_v22, %v3135_v33 }
 0xd39   : > { %v1965_v32 = vpop.f32.mrf.mxu0 }
 0xd3a   : > { %1971 = vst.msk [vmem:[%s2877_s21] sm:$0xff] %vm646_vm1, %v1969_v31  ;;  %v1966_v34 = vadd.f32 %v2223_v29, %v1965_v32 }
 0xd3b   : > { %v2411_v35 = vpop.f32.mrf.mxu0 }
 0xd3c   : > { %v1970_v36 = vadd.f32 %v1966_v34, %v3140_v11 }
 0xd3e   : > { %1972 = vst.msk [vmem:[%s2877_s21 + $0x8] sm:$0xff] %vm646_vm1, %v1970_v36 }
 0xd3f   : > { %2583 = shalt.err (!%p2580_p8)
}
 0xd40   : > { %s2584_s21 = scalar_lea.hbm %s3191_s27, 256  ;;  %s2588_s0 = scalar_lea.hbm %s3313_s4, 512 }
 0xd41   : > { %p2585_p10 = scmp.ne.s32.totalorder %s3191_s27, %s2584_s21  ;;  %p2589_p13 = scmp.lt.s32.totalorder %s3191_s27, %s3313_s4 }
 0xd42   : > { %p2590_p0 = scmp.lt.s32.totalorder %s2588_s0, %s2584_s21 }
 0xd43   : > { %p2586_p11 = pnand %p2585_p10, %p2796_p3 }
 0xd44   : > { %p2591_p1 = por %p2590_p0, %p2589_p13 }
 0xd45   : > { %p2587_p12 = pneg %p2586_p11 }
 0xd47   : > { %p2592_p2 = pnand %p2591_p1, %p2587_p12 }
 0xd49   : > { %2595 = shalt.err (!%p2592_p2)
}
 0xd4a   : > { %s2675_s24 = smov 128   ;;  %s2676_s19 = smov 8  }
 0xd4b   : > { %2412 = dma.vmem_to_hbm [thread:$0]  (%p2796_p3), %s3193_s23, 256, %s3191_s27, %s3200_s15, %s2675_s24, %s2675_s24, %s2676_s19  }
 0xd4c PF: > { %s3315_s16 = sld [smem:[#allocation12_spill]] }
 0xd4d   : > { %s3316_s1 = sld [smem:[#allocation5_spill]] }
 0xd52   : > { %p2418_p4 = scmp.ge.s32.totalorder %s3315_s16, 2 }
 0xd53   : > { %s2002_s28 = sand.u32 1, %s3316_s1  }
 0xd54   : > { %p2415_p5 = pnand %p2418_p4, %p2806_p9  ;;  %s2003_s30 = scalar_lea.sflag [#allocation3], %s2002_s28 }
 0xd56   : > { %p2416_p6 = pneg %p2415_p5 }
 0xd58   : > { %2629 = dma.done.wait (%p2416_p6), %s2003_s30, 256  }
 0xd59   : > { %2631 = vsyncadd (%p2416_p6), %s2003_s30, 4294967040  ;;  %s26_s15 = sadd.s32 1, %s3315_s16   ;;  %s3318_s25 = sld [smem:[#allocation6_spill]] }
 0xd5a   : > { %p23_p7 = scmp.ge.s32.totalorder %s26_s15, 6   ;;  %s3319_s26 = sld [smem:[#allocation7_spill]] }
 0xd5b   : > { %s3320_s27 = sld [smem:[#allocation17_spill]] }
 0xd5c   : > { %s3321_s28 = sld [smem:[#allocation10_spill]]  ;;  %25 = sbr.rel (!%p23_p7) target bundleno = 11 (0xb), region = 144 }
 0xd5d   : > { %s3322_s29 = sld [smem:[#allocation11_spill]] }
 0xd5e   : > { %s3323_s30 = sld [smem:[#allocation13_spill]] }
 0xd5f   : > { %s3324_s14 = sld [smem:[#allocation15_spill]] }
 0xd61   :  { %2008 = vsyncpa [#allocation3], 1 }
 0xd62   :  { %2010 = vsyncpa [#allocation3 + $0x1], 1 }

</bundles_post_ra>
